<compile_context>
chip_gen: v6e
topology: v6e:2x2x1
jax: 0.10.0
libtpu: 0.0.40
codegen_flags: <defaults>
</compile_context>

<pallas_src>
import jax
import jax.numpy as jnp
from jax import lax
from jax.experimental import pallas as pl
from jax.experimental.pallas import tpu as pltpu


# ----------------------------------------------------------------------------
# Fused kernel: all layers, both directions, whole problem resident in VMEM.
# ----------------------------------------------------------------------------
def _make_fused_bilstm_kernel(T, B, H, n_layers):
    """Layouts (all float32):
      x_ref   : (T*B, 2H)   schedule-order input, row-block t = [x(t) | x(T-1-t)]
      wih_ref : (L, 2H, 8H) block-diag, gate-interleaved input weights
      whh_ref : (L, 2H, 8H) block-diag, gate-interleaved hidden weights
      b_ref   : (L, 1, 8H)  combined biases (b_ih + b_hh), gate-interleaved
      out_ref : (T*B, 2H)   schedule-order outputs; also the inter-layer buffer
      pre_ref : (T*B, 8H)   scratch: per-layer gate pre-activations
    Gate columns: [i_f i_b | f_f f_b | g_f g_b | o_f o_b], each block H wide.
    Hidden/cell carry: (B, 2H) = [h_f | h_b], [c_f | c_b].
    """
    H2, H8 = 2 * H, 8 * H

    def kernel(x_ref, wih_ref, whh_ref, b_ref, out_ref, pre_ref):
        zeros = jnp.zeros((B, H2), jnp.float32)

        for l in range(n_layers):  # static Python loop: layers fused in one call
            # Schedule-order input for this layer.  Layer l-1's per-step outputs
            # are exactly layer l's schedule-order inputs (no reshuffle needed).
            x_sched = x_ref[...] if l == 0 else out_ref[...]          # (T*B, 2H)

            # Hoisted input projection for the whole layer: one lane-dense
            # (T*B, 2H) @ (2H, 8H) matmul + bias, staged to VMEM scratch.
            pre_ref[...] = (
                jnp.dot(x_sched, wih_ref[l], preferred_element_type=jnp.float32)
                + b_ref[l])

            whh = whh_ref[l]                                          # (2H, 8H)
            h = zeros   # [h_f | h_b], carried in registers across steps
            c = zeros   # [c_f | c_b]

            # Fully-unrolled serial recurrence (T small & static): one MXU op
            # per step covering both directions and all four gates.
            for t in range(T):
                r = t * B
                gates = pre_ref[pl.ds(r, B), :] + jnp.dot(
                    h, whh, preferred_element_type=jnp.float32)       # (B, 8H)
                i_g = jax.nn.sigmoid(gates[:, 0 * H2:1 * H2])
                f_g = jax.nn.sigmoid(gates[:, 1 * H2:2 * H2])
                g_g = jnp.tanh(gates[:, 2 * H2:3 * H2])
                o_g = jax.nn.sigmoid(gates[:, 3 * H2:4 * H2])
                c = f_g * c + i_g * g_g
                h = o_g * jnp.tanh(c)
                out_ref[pl.ds(r, B), :] = h     # one lane-dense (B,2H) store/step

    return kernel


@jax.jit
def bilstm_forward(x, prepped):
    """x: (B, T, H). prepped: output of prepare_params. Returns (f, b), batch-first."""
    B, T, H = x.shape
    wih, whh, bias = prepped["wih"], prepped["whh"], prepped["bias"]
    n_layers = wih.shape[0]
    Bp = ((B + 7) // 8) * 8                                    # pad batch to sublanes

    xp = jnp.pad(x.astype(jnp.float32), ((0, Bp - B), (0, 0), (0, 0)))
    x_tb = jnp.transpose(xp, (1, 0, 2))                        # (T, Bp, H), time-major
    # Schedule-order input: row-block t = [x(t) | x(T-1-t)]  (f stream | b stream).
    x_sched = jnp.concatenate([x_tb, x_tb[::-1]], axis=-1)     # (T, Bp, 2H)
    x_sched = x_sched.reshape(T * Bp, 2 * H)

    R, H2, H8 = T * Bp, 2 * H, 8 * H
    flops = n_layers * 4 * R * H2 * H8                         # projection + recurrence
    trans = n_layers * 10 * R * H                              # 5 nonlinearities on 2H lanes
    bytes_acc = 4 * (2 * R * H2 + n_layers * (2 * H2 * H8 + H8) + 2 * n_layers * R * H8)

    kernel = _make_fused_bilstm_kernel(T, Bp, H, n_layers)
    out = pl.pallas_call(
        kernel,
        grid=(1,),
        in_specs=[
            pl.BlockSpec((R, H2), lambda i: (0, 0)),
            pl.BlockSpec((n_layers, H2, H8), lambda i: (0, 0, 0)),
            pl.BlockSpec((n_layers, H2, H8), lambda i: (0, 0, 0)),
            pl.BlockSpec((n_layers, 1, H8), lambda i: (0, 0, 0)),
        ],
        out_specs=pl.BlockSpec((R, H2), lambda i: (0, 0)),
        out_shape=jax.ShapeDtypeStruct((R, H2), jnp.float32),
        scratch_shapes=[pltpu.VMEM((R, H8), jnp.float32)],     # per-layer pre-activations
        compiler_params=pltpu.CompilerParams(
            dimension_semantics=("arbitrary",)),
        cost_estimate=pl.CostEstimate(
            flops=int(flops), transcendentals=int(trans),
            bytes_accessed=int(bytes_acc)),
    )(x_sched, wih, whh, bias)

    out = out.reshape(T, Bp, H2)
    f = jnp.transpose(out[:, :, :H], (1, 0, 2))[:B]            # f half: already natural order
    b = jnp.transpose(out[::-1, :, H:], (1, 0, 2))[:B]         # b half: undo the time flip
    return f, b


# ----------------------------------------------------------------------------
# Parameter handling
# ----------------------------------------------------------------------------
def prepare_params(params, H):
    """One-time re-layout of nn.LSTM-shaped weights into the fused kernel layout.

    Builds block-diagonal, gate-interleaved matrices of shape (2H, 8H):
    rows [0:H] are the forward-direction input lanes, rows [H:2H] the backward
    direction; columns are [i_f i_b f_f f_b g_f g_b o_f o_b] (H wide each).
    One (B,2H)@(2H,8H) matmul then yields all eight gate blocks at once.
    """
    zero = jnp.zeros((H, H), jnp.float32)

    def blockdiag(wf, wb):
        wf_t = jnp.asarray(wf, jnp.float32).T            # (H, 4H), gate cols i,f,g,o
        wb_t = jnp.asarray(wb, jnp.float32).T
        cols = []
        for g in range(4):
            fg = wf_t[:, g * H:(g + 1) * H]
            bg = wb_t[:, g * H:(g + 1) * H]
            cols.append(jnp.concatenate([fg, zero], axis=0))   # f-dir column block
            cols.append(jnp.concatenate([zero, bg], axis=0))   # b-dir column block
        return jnp.concatenate(cols, axis=1)                   # (2H, 8H)

    def bias_cat(bf, bb):
        bf = jnp.asarray(bf, jnp.float32).reshape(4, H)
        bb = jnp.asarray(bb, jnp.float32).reshape(4, H)
        return jnp.stack([bf, bb], axis=1).reshape(1, 8 * H)   # [i_f i_b f_f f_b ...]

    wih = jnp.stack([blockdiag(l["w_ih_f"], l["w_ih_b"]) for l in params])
    whh = jnp.stack([blockdiag(l["w_hh_f"], l["w_hh_b"]) for l in params])
    bias = jnp.stack([bias_cat(l["b_f"], l["b_b"]) for l in params])
    return {"wih": wih, "whh": whh, "bias": bias}


def init_params(key, d_hidden, n_layers):
    """Deterministic init matching nn.LSTM shapes: W_ih/W_hh (4H, H), biases (4H,)."""
    bound = 1.0 / jnp.sqrt(d_hidden)
    params = []
    for _ in range(n_layers):
        keys = jax.random.split(key, 9)
        key = keys[0]
        u = lambda k, shape: jax.random.uniform(k, shape, jnp.float32, -bound, bound)
        layer = {
            "w_ih_f": u(keys[1], (4 * d_hidden, d_hidden)),
            "w_hh_f": u(keys[2], (4 * d_hidden, d_hidden)),
            # combined bias = b_ih + b_hh (only the sum is needed)
            "b_f": u(keys[3], (4 * d_hidden,)) + u(keys[4], (4 * d_hidden,)),
            "w_ih_b": u(keys[5], (4 * d_hidden, d_hidden)),
            "w_hh_b": u(keys[6], (4 * d_hidden, d_hidden)),
            "b_b": u(keys[7], (4 * d_hidden,)) + u(keys[8], (4 * d_hidden,)),
        }
        params.append(layer)
    return params


# ----------------------------------------------------------------------------
# Pure-JAX reference (lax.scan) for correctness checking.
# ----------------------------------------------------------------------------
def _lstm_direction_ref(x, w_ih, w_hh, bias, reverse):
    B, T, H = x.shape
    xs = jnp.transpose(x, (1, 0, 2))
    if reverse:
        xs = xs[::-1]

    def step(carry, x_t):
        h, c = carry
        gates = x_t @ w_ih.T + h @ w_hh.T + bias
        i_g = jax.nn.sigmoid(gates[:, 0 * H:1 * H])
        f_g = jax.nn.sigmoid(gates[:, 1 * H:2 * H])
        g_g = jnp.tanh(gates[:, 2 * H:3 * H])
        o_g = jax.nn.sigmoid(gates[:, 3 * H:4 * H])
        c_new = f_g * c + i_g * g_g
        h_new = o_g * jnp.tanh(c_new)
        return (h_new, c_new), h_new

    init = (jnp.zeros((B, H), jnp.float32), jnp.zeros((B, H), jnp.float32))
    _, hs = lax.scan(step, init, xs)
    if reverse:
        hs = hs[::-1]
    return jnp.transpose(hs, (1, 0, 2))


def bilstm_forward_ref(x, params):
    f, b = x, x
    for layer in params:
        f = _lstm_direction_ref(f, layer["w_ih_f"], layer["w_hh_f"], layer["b_f"], False)
        b = _lstm_direction_ref(b, layer["w_ih_b"], layer["w_hh_b"], layer["b_b"], True)
    return f, b


if __name__ == "__main__":
    B, T, H = 4, 8, 32          # batch, seq, d_hidden
    n_layers = 2
    # dropout p = 0.0 -> identity (eval-mode forward semantics)

    key = jax.random.PRNGKey(0)
    kx, kp = jax.random.split(key)
    x = jax.random.normal(kx, (B, T, H), dtype=jnp.float32)
    params = init_params(kp, H, n_layers)
    prepped = prepare_params(params, H)          # one-time weight re-layout

    f_out, b_out = bilstm_forward(x, prepped)
    f_out = jax.block_until_ready(f_out)
    b_out = jax.block_until_ready(b_out)

    f_ref, b_ref = bilstm_forward_ref(x, params)
    assert f_out.shape == (B, T, H) and b_out.shape == (B, T, H)
    assert jnp.allclose(f_out, f_ref, atol=1e-4), "forward stream mismatch"
    assert jnp.allclose(b_out, b_ref, atol=1e-4), "backward stream mismatch"

    print("KERNEL_OK")
</pallas_src>

<mosaic_0001>
module attributes {stable_mosaic.version = 11 : i64} {
  func.func @kernel(%arg0: i32, %arg1: memref<64x64xf32, #tpu.memory_space<vmem>>, %arg2: memref<2x64x256xf32, #tpu.memory_space<vmem>>, %arg3: memref<2x64x256xf32, #tpu.memory_space<vmem>>, %arg4: memref<2x1x256xf32, #tpu.memory_space<vmem>>, %arg5: memref<64x64xf32, #tpu.memory_space<vmem>>, %arg6: memref<64x256xf32, #tpu.memory_space<vmem>>) attributes {dimension_semantics = [#tpu.dimension_semantics<arbitrary>], iteration_bounds = array<i64: 1>, scalar_prefetch = 0 : i64, scratch_operands = 1 : i64, tpu.core_type = #tpu.core_type<tc>, window_params = [{pipeline_mode = #tpu.pipeline_mode<synchronous>, transform_indices = @transform_0, window_bounds = array<i64: 64, 64>}, {pipeline_mode = #tpu.pipeline_mode<synchronous>, transform_indices = @transform_1, window_bounds = array<i64: 2, 64, 256>}, {pipeline_mode = #tpu.pipeline_mode<synchronous>, transform_indices = @transform_2, window_bounds = array<i64: 2, 64, 256>}, {pipeline_mode = #tpu.pipeline_mode<synchronous>, transform_indices = @transform_3, window_bounds = array<i64: 2, 1, 256>}, {pipeline_mode = #tpu.pipeline_mode<synchronous>, transform_indices = @transform_4, window_bounds = array<i64: 64, 64>}]} {
    %cst = arith.constant 0.000000e+00 : f32
    %0 = vector.broadcast %cst : f32 to vector<8x64xf32>
    %c0 = arith.constant 0 : index
    %c0_0 = arith.constant 0 : index
    %1 = vector.load %arg1[%c0, %c0_0] : memref<64x64xf32, #tpu.memory_space<vmem>>, vector<64x64xf32>
    %c0_1 = arith.constant 0 : index
    %c0_2 = arith.constant 0 : index
    %c0_3 = arith.constant 0 : index
    %2 = vector.load %arg2[%c0_1, %c0_2, %c0_3] : memref<2x64x256xf32, #tpu.memory_space<vmem>>, vector<1x64x256xf32>
    %3 = vector.shape_cast %2 : vector<1x64x256xf32> to vector<64x256xf32>
    %cst_4 = arith.constant dense<0.000000e+00> : vector<64x256xf32>
    %4 = tpu.matmul %1, %3, %cst_4 {dimension_numbers = #tpu.dot_dimension_numbers<[1], [0], [0], [1], [0, 0, 1, 1], [], []>} : vector<64x64xf32>, vector<64x256xf32>, vector<64x256xf32> -> vector<64x256xf32>
    %c0_5 = arith.constant 0 : index
    %c0_6 = arith.constant 0 : index
    %c0_7 = arith.constant 0 : index
    %5 = vector.load %arg4[%c0_5, %c0_6, %c0_7] : memref<2x1x256xf32, #tpu.memory_space<vmem>>, vector<1x1x256xf32>
    %6 = vector.shape_cast %5 : vector<1x1x256xf32> to vector<1x256xf32>
    %7 = vector.broadcast %6 : vector<1x256xf32> to vector<64x256xf32>
    %8 = arith.addf %4, %7 : vector<64x256xf32>
    %c0_8 = arith.constant 0 : index
    %c0_9 = arith.constant 0 : index
    %9 = vector.load %arg6[%c0_8, %c0_9] : memref<64x256xf32, #tpu.memory_space<vmem>>, vector<64x256xf32>
    tpu.vector_store %arg6[%c0_8, %c0_9], %8 {strides = array<i32>} : memref<64x256xf32, #tpu.memory_space<vmem>>, vector<64x256xf32>,
    %c0_10 = arith.constant 0 : index
    %c0_11 = arith.constant 0 : index
    %c0_12 = arith.constant 0 : index
    %10 = vector.load %arg3[%c0_10, %c0_11, %c0_12] : memref<2x64x256xf32, #tpu.memory_space<vmem>>, vector<1x64x256xf32>
    %11 = vector.shape_cast %10 : vector<1x64x256xf32> to vector<64x256xf32>
    %c0_13 = arith.constant 0 : index
    %c0_14 = arith.constant 0 : index
    %12 = vector.load %arg6[%c0_13, %c0_14] : memref<64x256xf32, #tpu.memory_space<vmem>>, vector<8x256xf32>
    %cst_15 = arith.constant dense<0.000000e+00> : vector<8x256xf32>
    %13 = tpu.matmul %0, %11, %cst_15 {dimension_numbers = #tpu.dot_dimension_numbers<[1], [0], [0], [1], [0, 0, 1, 1], [], []>} : vector<8x64xf32>, vector<64x256xf32>, vector<8x256xf32> -> vector<8x256xf32>
    %14 = arith.addf %12, %13 : vector<8x256xf32>
    %15 = vector.extract_strided_slice %14 {offsets = [0, 0], sizes = [8, 64], strides = [1, 1]} : vector<8x256xf32> to vector<8x64xf32>
    %16 = arith.negf %15 : vector<8x64xf32>
    %17 = math.exp %16 : vector<8x64xf32>
    %cst_16 = arith.constant 1.000000e+00 : f32
    %18 = vector.broadcast %cst_16 : f32 to vector<8x64xf32>
    %19 = arith.addf %18, %17 : vector<8x64xf32>
    %20 = arith.divf %18, %19 : vector<8x64xf32>
    %21 = vector.extract_strided_slice %14 {offsets = [0, 64], sizes = [8, 64], strides = [1, 1]} : vector<8x256xf32> to vector<8x64xf32>
    %22 = arith.negf %21 : vector<8x64xf32>
    %23 = math.exp %22 : vector<8x64xf32>
    %cst_17 = arith.constant 1.000000e+00 : f32
    %24 = vector.broadcast %cst_17 : f32 to vector<8x64xf32>
    %25 = arith.addf %24, %23 : vector<8x64xf32>
    %26 = arith.divf %24, %25 : vector<8x64xf32>
    %27 = vector.extract_strided_slice %14 {offsets = [0, 128], sizes = [8, 64], strides = [1, 1]} : vector<8x256xf32> to vector<8x64xf32>
    %28 = math.tanh %27 : vector<8x64xf32>
    %29 = vector.extract_strided_slice %14 {offsets = [0, 192], sizes = [8, 64], strides = [1, 1]} : vector<8x256xf32> to vector<8x64xf32>
    %30 = arith.negf %29 : vector<8x64xf32>
    %31 = math.exp %30 : vector<8x64xf32>
    %cst_18 = arith.constant 1.000000e+00 : f32
    %32 = vector.broadcast %cst_18 : f32 to vector<8x64xf32>
    %33 = arith.addf %32, %31 : vector<8x64xf32>
    %34 = arith.divf %32, %33 : vector<8x64xf32>
    %35 = arith.mulf %26, %0 : vector<8x64xf32>
    %36 = arith.mulf %20, %28 : vector<8x64xf32>
    %37 = arith.addf %35, %36 : vector<8x64xf32>
    %38 = math.tanh %37 : vector<8x64xf32>
    %39 = arith.mulf %34, %38 : vector<8x64xf32>
    %c0_19 = arith.constant 0 : index
    %c0_20 = arith.constant 0 : index
    %40 = vector.load %arg5[%c0_19, %c0_20] : memref<64x64xf32, #tpu.memory_space<vmem>>, vector<8x64xf32>
    tpu.vector_store %arg5[%c0_19, %c0_20], %39 {strides = array<i32>} : memref<64x64xf32, #tpu.memory_space<vmem>>, vector<8x64xf32>,
    %c8 = arith.constant 8 : index
    %c0_21 = arith.constant 0 : index
    %41 = vector.load %arg6[%c8, %c0_21] : memref<64x256xf32, #tpu.memory_space<vmem>>, vector<8x256xf32>
    %cst_22 = arith.constant dense<0.000000e+00> : vector<8x256xf32>
    %42 = tpu.matmul %39, %11, %cst_22 {dimension_numbers = #tpu.dot_dimension_numbers<[1], [0], [0], [1], [0, 0, 1, 1], [], []>} : vector<8x64xf32>, vector<64x256xf32>, vector<8x256xf32> -> vector<8x256xf32>
    %43 = arith.addf %41, %42 : vector<8x256xf32>
    %44 = vector.extract_strided_slice %43 {offsets = [0, 0], sizes = [8, 64], strides = [1, 1]} : vector<8x256xf32> to vector<8x64xf32>
    %45 = arith.negf %44 : vector<8x64xf32>
    %46 = math.exp %45 : vector<8x64xf32>
    %cst_23 = arith.constant 1.000000e+00 : f32
    %47 = vector.broadcast %cst_23 : f32 to vector<8x64xf32>
    %48 = arith.addf %47, %46 : vector<8x64xf32>
    %49 = arith.divf %47, %48 : vector<8x64xf32>
    %50 = vector.extract_strided_slice %43 {offsets = [0, 64], sizes = [8, 64], strides = [1, 1]} : vector<8x256xf32> to vector<8x64xf32>
    %51 = arith.negf %50 : vector<8x64xf32>
    %52 = math.exp %51 : vector<8x64xf32>
    %cst_24 = arith.constant 1.000000e+00 : f32
    %53 = vector.broadcast %cst_24 : f32 to vector<8x64xf32>
    %54 = arith.addf %53, %52 : vector<8x64xf32>
    %55 = arith.divf %53, %54 : vector<8x64xf32>
    %56 = vector.extract_strided_slice %43 {offsets = [0, 128], sizes = [8, 64], strides = [1, 1]} : vector<8x256xf32> to vector<8x64xf32>
    %57 = math.tanh %56 : vector<8x64xf32>
    %58 = vector.extract_strided_slice %43 {offsets = [0, 192], sizes = [8, 64], strides = [1, 1]} : vector<8x256xf32> to vector<8x64xf32>
    %59 = arith.negf %58 : vector<8x64xf32>
    %60 = math.exp %59 : vector<8x64xf32>
    %cst_25 = arith.constant 1.000000e+00 : f32
    %61 = vector.broadcast %cst_25 : f32 to vector<8x64xf32>
    %62 = arith.addf %61, %60 : vector<8x64xf32>
    %63 = arith.divf %61, %62 : vector<8x64xf32>
    %64 = arith.mulf %55, %37 : vector<8x64xf32>
    %65 = arith.mulf %49, %57 : vector<8x64xf32>
    %66 = arith.addf %64, %65 : vector<8x64xf32>
    %67 = math.tanh %66 : vector<8x64xf32>
    %68 = arith.mulf %63, %67 : vector<8x64xf32>
    %c8_26 = arith.constant 8 : index
    %c0_27 = arith.constant 0 : index
    %69 = vector.load %arg5[%c8_26, %c0_27] : memref<64x64xf32, #tpu.memory_space<vmem>>, vector<8x64xf32>
    tpu.vector_store %arg5[%c8_26, %c0_27], %68 {strides = array<i32>} : memref<64x64xf32, #tpu.memory_space<vmem>>, vector<8x64xf32>,
    %c16 = arith.constant 16 : index
    %c0_28 = arith.constant 0 : index
    %70 = vector.load %arg6[%c16, %c0_28] : memref<64x256xf32, #tpu.memory_space<vmem>>, vector<8x256xf32>
    %cst_29 = arith.constant dense<0.000000e+00> : vector<8x256xf32>
    %71 = tpu.matmul %68, %11, %cst_29 {dimension_numbers = #tpu.dot_dimension_numbers<[1], [0], [0], [1], [0, 0, 1, 1], [], []>} : vector<8x64xf32>, vector<64x256xf32>, vector<8x256xf32> -> vector<8x256xf32>
    %72 = arith.addf %70, %71 : vector<8x256xf32>
    %73 = vector.extract_strided_slice %72 {offsets = [0, 0], sizes = [8, 64], strides = [1, 1]} : vector<8x256xf32> to vector<8x64xf32>
    %74 = arith.negf %73 : vector<8x64xf32>
    %75 = math.exp %74 : vector<8x64xf32>
    %cst_30 = arith.constant 1.000000e+00 : f32
    %76 = vector.broadcast %cst_30 : f32 to vector<8x64xf32>
    %77 = arith.addf %76, %75 : vector<8x64xf32>
    %78 = arith.divf %76, %77 : vector<8x64xf32>
    %79 = vector.extract_strided_slice %72 {offsets = [0, 64], sizes = [8, 64], strides = [1, 1]} : vector<8x256xf32> to vector<8x64xf32>
    %80 = arith.negf %79 : vector<8x64xf32>
    %81 = math.exp %80 : vector<8x64xf32>
    %cst_31 = arith.constant 1.000000e+00 : f32
    %82 = vector.broadcast %cst_31 : f32 to vector<8x64xf32>
    %83 = arith.addf %82, %81 : vector<8x64xf32>
    %84 = arith.divf %82, %83 : vector<8x64xf32>
    %85 = vector.extract_strided_slice %72 {offsets = [0, 128], sizes = [8, 64], strides = [1, 1]} : vector<8x256xf32> to vector<8x64xf32>
    %86 = math.tanh %85 : vector<8x64xf32>
    %87 = vector.extract_strided_slice %72 {offsets = [0, 192], sizes = [8, 64], strides = [1, 1]} : vector<8x256xf32> to vector<8x64xf32>
    %88 = arith.negf %87 : vector<8x64xf32>
    %89 = math.exp %88 : vector<8x64xf32>
    %cst_32 = arith.constant 1.000000e+00 : f32
    %90 = vector.broadcast %cst_32 : f32 to vector<8x64xf32>
    %91 = arith.addf %90, %89 : vector<8x64xf32>
    %92 = arith.divf %90, %91 : vector<8x64xf32>
    %93 = arith.mulf %84, %66 : vector<8x64xf32>
    %94 = arith.mulf %78, %86 : vector<8x64xf32>
    %95 = arith.addf %93, %94 : vector<8x64xf32>
    %96 = math.tanh %95 : vector<8x64xf32>
    %97 = arith.mulf %92, %96 : vector<8x64xf32>
    %c16_33 = arith.constant 16 : index
    %c0_34 = arith.constant 0 : index
    %98 = vector.load %arg5[%c16_33, %c0_34] : memref<64x64xf32, #tpu.memory_space<vmem>>, vector<8x64xf32>
    tpu.vector_store %arg5[%c16_33, %c0_34], %97 {strides = array<i32>} : memref<64x64xf32, #tpu.memory_space<vmem>>, vector<8x64xf32>,
    %c24 = arith.constant 24 : index
    %c0_35 = arith.constant 0 : index
    %99 = vector.load %arg6[%c24, %c0_35] : memref<64x256xf32, #tpu.memory_space<vmem>>, vector<8x256xf32>
    %cst_36 = arith.constant dense<0.000000e+00> : vector<8x256xf32>
    %100 = tpu.matmul %97, %11, %cst_36 {dimension_numbers = #tpu.dot_dimension_numbers<[1], [0], [0], [1], [0, 0, 1, 1], [], []>} : vector<8x64xf32>, vector<64x256xf32>, vector<8x256xf32> -> vector<8x256xf32>
    %101 = arith.addf %99, %100 : vector<8x256xf32>
    %102 = vector.extract_strided_slice %101 {offsets = [0, 0], sizes = [8, 64], strides = [1, 1]} : vector<8x256xf32> to vector<8x64xf32>
    %103 = arith.negf %102 : vector<8x64xf32>
    %104 = math.exp %103 : vector<8x64xf32>
    %cst_37 = arith.constant 1.000000e+00 : f32
    %105 = vector.broadcast %cst_37 : f32 to vector<8x64xf32>
    %106 = arith.addf %105, %104 : vector<8x64xf32>
    %107 = arith.divf %105, %106 : vector<8x64xf32>
    %108 = vector.extract_strided_slice %101 {offsets = [0, 64], sizes = [8, 64], strides = [1, 1]} : vector<8x256xf32> to vector<8x64xf32>
    %109 = arith.negf %108 : vector<8x64xf32>
    %110 = math.exp %109 : vector<8x64xf32>
    %cst_38 = arith.constant 1.000000e+00 : f32
    %111 = vector.broadcast %cst_38 : f32 to vector<8x64xf32>
    %112 = arith.addf %111, %110 : vector<8x64xf32>
    %113 = arith.divf %111, %112 : vector<8x64xf32>
    %114 = vector.extract_strided_slice %101 {offsets = [0, 128], sizes = [8, 64], strides = [1, 1]} : vector<8x256xf32> to vector<8x64xf32>
    %115 = math.tanh %114 : vector<8x64xf32>
    %116 = vector.extract_strided_slice %101 {offsets = [0, 192], sizes = [8, 64], strides = [1, 1]} : vector<8x256xf32> to vector<8x64xf32>
    %117 = arith.negf %116 : vector<8x64xf32>
    %118 = math.exp %117 : vector<8x64xf32>
    %cst_39 = arith.constant 1.000000e+00 : f32
    %119 = vector.broadcast %cst_39 : f32 to vector<8x64xf32>
    %120 = arith.addf %119, %118 : vector<8x64xf32>
    %121 = arith.divf %119, %120 : vector<8x64xf32>
    %122 = arith.mulf %113, %95 : vector<8x64xf32>
    %123 = arith.mulf %107, %115 : vector<8x64xf32>
    %124 = arith.addf %122, %123 : vector<8x64xf32>
    %125 = math.tanh %124 : vector<8x64xf32>
    %126 = arith.mulf %121, %125 : vector<8x64xf32>
    %c24_40 = arith.constant 24 : index
    %c0_41 = arith.constant 0 : index
    %127 = vector.load %arg5[%c24_40, %c0_41] : memref<64x64xf32, #tpu.memory_space<vmem>>, vector<8x64xf32>
    tpu.vector_store %arg5[%c24_40, %c0_41], %126 {strides = array<i32>} : memref<64x64xf32, #tpu.memory_space<vmem>>, vector<8x64xf32>,
    %c32 = arith.constant 32 : index
    %c0_42 = arith.constant 0 : index
    %128 = vector.load %arg6[%c32, %c0_42] : memref<64x256xf32, #tpu.memory_space<vmem>>, vector<8x256xf32>
    %cst_43 = arith.constant dense<0.000000e+00> : vector<8x256xf32>
    %129 = tpu.matmul %126, %11, %cst_43 {dimension_numbers = #tpu.dot_dimension_numbers<[1], [0], [0], [1], [0, 0, 1, 1], [], []>} : vector<8x64xf32>, vector<64x256xf32>, vector<8x256xf32> -> vector<8x256xf32>
    %130 = arith.addf %128, %129 : vector<8x256xf32>
    %131 = vector.extract_strided_slice %130 {offsets = [0, 0], sizes = [8, 64], strides = [1, 1]} : vector<8x256xf32> to vector<8x64xf32>
    %132 = arith.negf %131 : vector<8x64xf32>
    %133 = math.exp %132 : vector<8x64xf32>
    %cst_44 = arith.constant 1.000000e+00 : f32
    %134 = vector.broadcast %cst_44 : f32 to vector<8x64xf32>
    %135 = arith.addf %134, %133 : vector<8x64xf32>
    %136 = arith.divf %134, %135 : vector<8x64xf32>
    %137 = vector.extract_strided_slice %130 {offsets = [0, 64], sizes = [8, 64], strides = [1, 1]} : vector<8x256xf32> to vector<8x64xf32>
    %138 = arith.negf %137 : vector<8x64xf32>
    %139 = math.exp %138 : vector<8x64xf32>
    %cst_45 = arith.constant 1.000000e+00 : f32
    %140 = vector.broadcast %cst_45 : f32 to vector<8x64xf32>
    %141 = arith.addf %140, %139 : vector<8x64xf32>
    %142 = arith.divf %140, %141 : vector<8x64xf32>
    %143 = vector.extract_strided_slice %130 {offsets = [0, 128], sizes = [8, 64], strides = [1, 1]} : vector<8x256xf32> to vector<8x64xf32>
    %144 = math.tanh %143 : vector<8x64xf32>
    %145 = vector.extract_strided_slice %130 {offsets = [0, 192], sizes = [8, 64], strides = [1, 1]} : vector<8x256xf32> to vector<8x64xf32>
    %146 = arith.negf %145 : vector<8x64xf32>
    %147 = math.exp %146 : vector<8x64xf32>
    %cst_46 = arith.constant 1.000000e+00 : f32
    %148 = vector.broadcast %cst_46 : f32 to vector<8x64xf32>
    %149 = arith.addf %148, %147 : vector<8x64xf32>
    %150 = arith.divf %148, %149 : vector<8x64xf32>
    %151 = arith.mulf %142, %124 : vector<8x64xf32>
    %152 = arith.mulf %136, %144 : vector<8x64xf32>
    %153 = arith.addf %151, %152 : vector<8x64xf32>
    %154 = math.tanh %153 : vector<8x64xf32>
    %155 = arith.mulf %150, %154 : vector<8x64xf32>
    %c32_47 = arith.constant 32 : index
    %c0_48 = arith.constant 0 : index
    %156 = vector.load %arg5[%c32_47, %c0_48] : memref<64x64xf32, #tpu.memory_space<vmem>>, vector<8x64xf32>
    tpu.vector_store %arg5[%c32_47, %c0_48], %155 {strides = array<i32>} : memref<64x64xf32, #tpu.memory_space<vmem>>, vector<8x64xf32>,
    %c40 = arith.constant 40 : index
    %c0_49 = arith.constant 0 : index
    %157 = vector.load %arg6[%c40, %c0_49] : memref<64x256xf32, #tpu.memory_space<vmem>>, vector<8x256xf32>
    %cst_50 = arith.constant dense<0.000000e+00> : vector<8x256xf32>
    %158 = tpu.matmul %155, %11, %cst_50 {dimension_numbers = #tpu.dot_dimension_numbers<[1], [0], [0], [1], [0, 0, 1, 1], [], []>} : vector<8x64xf32>, vector<64x256xf32>, vector<8x256xf32> -> vector<8x256xf32>
    %159 = arith.addf %157, %158 : vector<8x256xf32>
    %160 = vector.extract_strided_slice %159 {offsets = [0, 0], sizes = [8, 64], strides = [1, 1]} : vector<8x256xf32> to vector<8x64xf32>
    %161 = arith.negf %160 : vector<8x64xf32>
    %162 = math.exp %161 : vector<8x64xf32>
    %cst_51 = arith.constant 1.000000e+00 : f32
    %163 = vector.broadcast %cst_51 : f32 to vector<8x64xf32>
    %164 = arith.addf %163, %162 : vector<8x64xf32>
    %165 = arith.divf %163, %164 : vector<8x64xf32>
    %166 = vector.extract_strided_slice %159 {offsets = [0, 64], sizes = [8, 64], strides = [1, 1]} : vector<8x256xf32> to vector<8x64xf32>
    %167 = arith.negf %166 : vector<8x64xf32>
    %168 = math.exp %167 : vector<8x64xf32>
    %cst_52 = arith.constant 1.000000e+00 : f32
    %169 = vector.broadcast %cst_52 : f32 to vector<8x64xf32>
    %170 = arith.addf %169, %168 : vector<8x64xf32>
    %171 = arith.divf %169, %170 : vector<8x64xf32>
    %172 = vector.extract_strided_slice %159 {offsets = [0, 128], sizes = [8, 64], strides = [1, 1]} : vector<8x256xf32> to vector<8x64xf32>
    %173 = math.tanh %172 : vector<8x64xf32>
    %174 = vector.extract_strided_slice %159 {offsets = [0, 192], sizes = [8, 64], strides = [1, 1]} : vector<8x256xf32> to vector<8x64xf32>
    %175 = arith.negf %174 : vector<8x64xf32>
    %176 = math.exp %175 : vector<8x64xf32>
    %cst_53 = arith.constant 1.000000e+00 : f32
    %177 = vector.broadcast %cst_53 : f32 to vector<8x64xf32>
    %178 = arith.addf %177, %176 : vector<8x64xf32>
    %179 = arith.divf %177, %178 : vector<8x64xf32>
    %180 = arith.mulf %171, %153 : vector<8x64xf32>
    %181 = arith.mulf %165, %173 : vector<8x64xf32>
    %182 = arith.addf %180, %181 : vector<8x64xf32>
    %183 = math.tanh %182 : vector<8x64xf32>
    %184 = arith.mulf %179, %183 : vector<8x64xf32>
    %c40_54 = arith.constant 40 : index
    %c0_55 = arith.constant 0 : index
    %185 = vector.load %arg5[%c40_54, %c0_55] : memref<64x64xf32, #tpu.memory_space<vmem>>, vector<8x64xf32>
    tpu.vector_store %arg5[%c40_54, %c0_55], %184 {strides = array<i32>} : memref<64x64xf32, #tpu.memory_space<vmem>>, vector<8x64xf32>,
    %c48 = arith.constant 48 : index
    %c0_56 = arith.constant 0 : index
    %186 = vector.load %arg6[%c48, %c0_56] : memref<64x256xf32, #tpu.memory_space<vmem>>, vector<8x256xf32>
    %cst_57 = arith.constant dense<0.000000e+00> : vector<8x256xf32>
    %187 = tpu.matmul %184, %11, %cst_57 {dimension_numbers = #tpu.dot_dimension_numbers<[1], [0], [0], [1], [0, 0, 1, 1], [], []>} : vector<8x64xf32>, vector<64x256xf32>, vector<8x256xf32> -> vector<8x256xf32>
    %188 = arith.addf %186, %187 : vector<8x256xf32>
    %189 = vector.extract_strided_slice %188 {offsets = [0, 0], sizes = [8, 64], strides = [1, 1]} : vector<8x256xf32> to vector<8x64xf32>
    %190 = arith.negf %189 : vector<8x64xf32>
    %191 = math.exp %190 : vector<8x64xf32>
    %cst_58 = arith.constant 1.000000e+00 : f32
    %192 = vector.broadcast %cst_58 : f32 to vector<8x64xf32>
    %193 = arith.addf %192, %191 : vector<8x64xf32>
    %194 = arith.divf %192, %193 : vector<8x64xf32>
    %195 = vector.extract_strided_slice %188 {offsets = [0, 64], sizes = [8, 64], strides = [1, 1]} : vector<8x256xf32> to vector<8x64xf32>
    %196 = arith.negf %195 : vector<8x64xf32>
    %197 = math.exp %196 : vector<8x64xf32>
    %cst_59 = arith.constant 1.000000e+00 : f32
    %198 = vector.broadcast %cst_59 : f32 to vector<8x64xf32>
    %199 = arith.addf %198, %197 : vector<8x64xf32>
    %200 = arith.divf %198, %199 : vector<8x64xf32>
    %201 = vector.extract_strided_slice %188 {offsets = [0, 128], sizes = [8, 64], strides = [1, 1]} : vector<8x256xf32> to vector<8x64xf32>
    %202 = math.tanh %201 : vector<8x64xf32>
    %203 = vector.extract_strided_slice %188 {offsets = [0, 192], sizes = [8, 64], strides = [1, 1]} : vector<8x256xf32> to vector<8x64xf32>
    %204 = arith.negf %203 : vector<8x64xf32>
    %205 = math.exp %204 : vector<8x64xf32>
    %cst_60 = arith.constant 1.000000e+00 : f32
    %206 = vector.broadcast %cst_60 : f32 to vector<8x64xf32>
    %207 = arith.addf %206, %205 : vector<8x64xf32>
    %208 = arith.divf %206, %207 : vector<8x64xf32>
    %209 = arith.mulf %200, %182 : vector<8x64xf32>
    %210 = arith.mulf %194, %202 : vector<8x64xf32>
    %211 = arith.addf %209, %210 : vector<8x64xf32>
    %212 = math.tanh %211 : vector<8x64xf32>
    %213 = arith.mulf %208, %212 : vector<8x64xf32>
    %c48_61 = arith.constant 48 : index
    %c0_62 = arith.constant 0 : index
    %214 = vector.load %arg5[%c48_61, %c0_62] : memref<64x64xf32, #tpu.memory_space<vmem>>, vector<8x64xf32>
    tpu.vector_store %arg5[%c48_61, %c0_62], %213 {strides = array<i32>} : memref<64x64xf32, #tpu.memory_space<vmem>>, vector<8x64xf32>,
    %c56 = arith.constant 56 : index
    %c0_63 = arith.constant 0 : index
    %215 = vector.load %arg6[%c56, %c0_63] : memref<64x256xf32, #tpu.memory_space<vmem>>, vector<8x256xf32>
    %cst_64 = arith.constant dense<0.000000e+00> : vector<8x256xf32>
    %216 = tpu.matmul %213, %11, %cst_64 {dimension_numbers = #tpu.dot_dimension_numbers<[1], [0], [0], [1], [0, 0, 1, 1], [], []>} : vector<8x64xf32>, vector<64x256xf32>, vector<8x256xf32> -> vector<8x256xf32>
    %217 = arith.addf %215, %216 : vector<8x256xf32>
    %218 = vector.extract_strided_slice %217 {offsets = [0, 0], sizes = [8, 64], strides = [1, 1]} : vector<8x256xf32> to vector<8x64xf32>
    %219 = arith.negf %218 : vector<8x64xf32>
    %220 = math.exp %219 : vector<8x64xf32>
    %cst_65 = arith.constant 1.000000e+00 : f32
    %221 = vector.broadcast %cst_65 : f32 to vector<8x64xf32>
    %222 = arith.addf %221, %220 : vector<8x64xf32>
    %223 = arith.divf %221, %222 : vector<8x64xf32>
    %224 = vector.extract_strided_slice %217 {offsets = [0, 64], sizes = [8, 64], strides = [1, 1]} : vector<8x256xf32> to vector<8x64xf32>
    %225 = arith.negf %224 : vector<8x64xf32>
    %226 = math.exp %225 : vector<8x64xf32>
    %cst_66 = arith.constant 1.000000e+00 : f32
    %227 = vector.broadcast %cst_66 : f32 to vector<8x64xf32>
    %228 = arith.addf %227, %226 : vector<8x64xf32>
    %229 = arith.divf %227, %228 : vector<8x64xf32>
    %230 = vector.extract_strided_slice %217 {offsets = [0, 128], sizes = [8, 64], strides = [1, 1]} : vector<8x256xf32> to vector<8x64xf32>
    %231 = math.tanh %230 : vector<8x64xf32>
    %232 = vector.extract_strided_slice %217 {offsets = [0, 192], sizes = [8, 64], strides = [1, 1]} : vector<8x256xf32> to vector<8x64xf32>
    %233 = arith.negf %232 : vector<8x64xf32>
    %234 = math.exp %233 : vector<8x64xf32>
    %cst_67 = arith.constant 1.000000e+00 : f32
    %235 = vector.broadcast %cst_67 : f32 to vector<8x64xf32>
    %236 = arith.addf %235, %234 : vector<8x64xf32>
    %237 = arith.divf %235, %236 : vector<8x64xf32>
    %238 = arith.mulf %229, %211 : vector<8x64xf32>
    %239 = arith.mulf %223, %231 : vector<8x64xf32>
    %240 = arith.addf %238, %239 : vector<8x64xf32>
    %241 = math.tanh %240 : vector<8x64xf32>
    %242 = arith.mulf %237, %241 : vector<8x64xf32>
    %c56_68 = arith.constant 56 : index
    %c0_69 = arith.constant 0 : index
    %243 = vector.load %arg5[%c56_68, %c0_69] : memref<64x64xf32, #tpu.memory_space<vmem>>, vector<8x64xf32>
    tpu.vector_store %arg5[%c56_68, %c0_69], %242 {strides = array<i32>} : memref<64x64xf32, #tpu.memory_space<vmem>>, vector<8x64xf32>,
    %c0_70 = arith.constant 0 : index
    %c0_71 = arith.constant 0 : index
    %244 = vector.load %arg5[%c0_70, %c0_71] : memref<64x64xf32, #tpu.memory_space<vmem>>, vector<64x64xf32>
    %c1 = arith.constant 1 : index
    %c0_72 = arith.constant 0 : index
    %c0_73 = arith.constant 0 : index
    %245 = vector.load %arg2[%c1, %c0_72, %c0_73] : memref<2x64x256xf32, #tpu.memory_space<vmem>>, vector<1x64x256xf32>
    %246 = vector.shape_cast %245 : vector<1x64x256xf32> to vector<64x256xf32>
    %cst_74 = arith.constant dense<0.000000e+00> : vector<64x256xf32>
    %247 = tpu.matmul %244, %246, %cst_74 {dimension_numbers = #tpu.dot_dimension_numbers<[1], [0], [0], [1], [0, 0, 1, 1], [], []>} : vector<64x64xf32>, vector<64x256xf32>, vector<64x256xf32> -> vector<64x256xf32>
    %c1_75 = arith.constant 1 : index
    %c0_76 = arith.constant 0 : index
    %c0_77 = arith.constant 0 : index
    %248 = vector.load %arg4[%c1_75, %c0_76, %c0_77] : memref<2x1x256xf32, #tpu.memory_space<vmem>>, vector<1x1x256xf32>
    %249 = vector.shape_cast %248 : vector<1x1x256xf32> to vector<1x256xf32>
    %250 = vector.broadcast %249 : vector<1x256xf32> to vector<64x256xf32>
    %251 = arith.addf %247, %250 : vector<64x256xf32>
    %c0_78 = arith.constant 0 : index
    %c0_79 = arith.constant 0 : index
    %252 = vector.load %arg6[%c0_78, %c0_79] : memref<64x256xf32, #tpu.memory_space<vmem>>, vector<64x256xf32>
    tpu.vector_store %arg6[%c0_78, %c0_79], %251 {strides = array<i32>} : memref<64x256xf32, #tpu.memory_space<vmem>>, vector<64x256xf32>,
    %c1_80 = arith.constant 1 : index
    %c0_81 = arith.constant 0 : index
    %c0_82 = arith.constant 0 : index
    %253 = vector.load %arg3[%c1_80, %c0_81, %c0_82] : memref<2x64x256xf32, #tpu.memory_space<vmem>>, vector<1x64x256xf32>
    %254 = vector.shape_cast %253 : vector<1x64x256xf32> to vector<64x256xf32>
    %c0_83 = arith.constant 0 : index
    %c0_84 = arith.constant 0 : index
    %255 = vector.load %arg6[%c0_83, %c0_84] : memref<64x256xf32, #tpu.memory_space<vmem>>, vector<8x256xf32>
    %cst_85 = arith.constant dense<0.000000e+00> : vector<8x256xf32>
    %256 = tpu.matmul %0, %254, %cst_85 {dimension_numbers = #tpu.dot_dimension_numbers<[1], [0], [0], [1], [0, 0, 1, 1], [], []>} : vector<8x64xf32>, vector<64x256xf32>, vector<8x256xf32> -> vector<8x256xf32>
    %257 = arith.addf %255, %256 : vector<8x256xf32>
    %258 = vector.extract_strided_slice %257 {offsets = [0, 0], sizes = [8, 64], strides = [1, 1]} : vector<8x256xf32> to vector<8x64xf32>
    %259 = arith.negf %258 : vector<8x64xf32>
    %260 = math.exp %259 : vector<8x64xf32>
    %cst_86 = arith.constant 1.000000e+00 : f32
    %261 = vector.broadcast %cst_86 : f32 to vector<8x64xf32>
    %262 = arith.addf %261, %260 : vector<8x64xf32>
    %263 = arith.divf %261, %262 : vector<8x64xf32>
    %264 = vector.extract_strided_slice %257 {offsets = [0, 64], sizes = [8, 64], strides = [1, 1]} : vector<8x256xf32> to vector<8x64xf32>
    %265 = arith.negf %264 : vector<8x64xf32>
    %266 = math.exp %265 : vector<8x64xf32>
    %cst_87 = arith.constant 1.000000e+00 : f32
    %267 = vector.broadcast %cst_87 : f32 to vector<8x64xf32>
    %268 = arith.addf %267, %266 : vector<8x64xf32>
    %269 = arith.divf %267, %268 : vector<8x64xf32>
    %270 = vector.extract_strided_slice %257 {offsets = [0, 128], sizes = [8, 64], strides = [1, 1]} : vector<8x256xf32> to vector<8x64xf32>
    %271 = math.tanh %270 : vector<8x64xf32>
    %272 = vector.extract_strided_slice %257 {offsets = [0, 192], sizes = [8, 64], strides = [1, 1]} : vector<8x256xf32> to vector<8x64xf32>
    %273 = arith.negf %272 : vector<8x64xf32>
    %274 = math.exp %273 : vector<8x64xf32>
    %cst_88 = arith.constant 1.000000e+00 : f32
    %275 = vector.broadcast %cst_88 : f32 to vector<8x64xf32>
    %276 = arith.addf %275, %274 : vector<8x64xf32>
    %277 = arith.divf %275, %276 : vector<8x64xf32>
    %278 = arith.mulf %269, %0 : vector<8x64xf32>
    %279 = arith.mulf %263, %271 : vector<8x64xf32>
    %280 = arith.addf %278, %279 : vector<8x64xf32>
    %281 = math.tanh %280 : vector<8x64xf32>
    %282 = arith.mulf %277, %281 : vector<8x64xf32>
    %c0_89 = arith.constant 0 : index
    %c0_90 = arith.constant 0 : index
    %283 = vector.load %arg5[%c0_89, %c0_90] : memref<64x64xf32, #tpu.memory_space<vmem>>, vector<8x64xf32>
    tpu.vector_store %arg5[%c0_89, %c0_90], %282 {strides = array<i32>} : memref<64x64xf32, #tpu.memory_space<vmem>>, vector<8x64xf32>,
    %c8_91 = arith.constant 8 : index
    %c0_92 = arith.constant 0 : index
    %284 = vector.load %arg6[%c8_91, %c0_92] : memref<64x256xf32, #tpu.memory_space<vmem>>, vector<8x256xf32>
    %cst_93 = arith.constant dense<0.000000e+00> : vector<8x256xf32>
    %285 = tpu.matmul %282, %254, %cst_93 {dimension_numbers = #tpu.dot_dimension_numbers<[1], [0], [0], [1], [0, 0, 1, 1], [], []>} : vector<8x64xf32>, vector<64x256xf32>, vector<8x256xf32> -> vector<8x256xf32>
    %286 = arith.addf %284, %285 : vector<8x256xf32>
    %287 = vector.extract_strided_slice %286 {offsets = [0, 0], sizes = [8, 64], strides = [1, 1]} : vector<8x256xf32> to vector<8x64xf32>
    %288 = arith.negf %287 : vector<8x64xf32>
    %289 = math.exp %288 : vector<8x64xf32>
    %cst_94 = arith.constant 1.000000e+00 : f32
    %290 = vector.broadcast %cst_94 : f32 to vector<8x64xf32>
    %291 = arith.addf %290, %289 : vector<8x64xf32>
    %292 = arith.divf %290, %291 : vector<8x64xf32>
    %293 = vector.extract_strided_slice %286 {offsets = [0, 64], sizes = [8, 64], strides = [1, 1]} : vector<8x256xf32> to vector<8x64xf32>
    %294 = arith.negf %293 : vector<8x64xf32>
    %295 = math.exp %294 : vector<8x64xf32>
    %cst_95 = arith.constant 1.000000e+00 : f32
    %296 = vector.broadcast %cst_95 : f32 to vector<8x64xf32>
    %297 = arith.addf %296, %295 : vector<8x64xf32>
    %298 = arith.divf %296, %297 : vector<8x64xf32>
    %299 = vector.extract_strided_slice %286 {offsets = [0, 128], sizes = [8, 64], strides = [1, 1]} : vector<8x256xf32> to vector<8x64xf32>
    %300 = math.tanh %299 : vector<8x64xf32>
    %301 = vector.extract_strided_slice %286 {offsets = [0, 192], sizes = [8, 64], strides = [1, 1]} : vector<8x256xf32> to vector<8x64xf32>
    %302 = arith.negf %301 : vector<8x64xf32>
    %303 = math.exp %302 : vector<8x64xf32>
    %cst_96 = arith.constant 1.000000e+00 : f32
    %304 = vector.broadcast %cst_96 : f32 to vector<8x64xf32>
    %305 = arith.addf %304, %303 : vector<8x64xf32>
    %306 = arith.divf %304, %305 : vector<8x64xf32>
    %307 = arith.mulf %298, %280 : vector<8x64xf32>
    %308 = arith.mulf %292, %300 : vector<8x64xf32>
    %309 = arith.addf %307, %308 : vector<8x64xf32>
    %310 = math.tanh %309 : vector<8x64xf32>
    %311 = arith.mulf %306, %310 : vector<8x64xf32>
    %c8_97 = arith.constant 8 : index
    %c0_98 = arith.constant 0 : index
    %312 = vector.load %arg5[%c8_97, %c0_98] : memref<64x64xf32, #tpu.memory_space<vmem>>, vector<8x64xf32>
    tpu.vector_store %arg5[%c8_97, %c0_98], %311 {strides = array<i32>} : memref<64x64xf32, #tpu.memory_space<vmem>>, vector<8x64xf32>,
    %c16_99 = arith.constant 16 : index
    %c0_100 = arith.constant 0 : index
    %313 = vector.load %arg6[%c16_99, %c0_100] : memref<64x256xf32, #tpu.memory_space<vmem>>, vector<8x256xf32>
    %cst_101 = arith.constant dense<0.000000e+00> : vector<8x256xf32>
    %314 = tpu.matmul %311, %254, %cst_101 {dimension_numbers = #tpu.dot_dimension_numbers<[1], [0], [0], [1], [0, 0, 1, 1], [], []>} : vector<8x64xf32>, vector<64x256xf32>, vector<8x256xf32> -> vector<8x256xf32>
    %315 = arith.addf %313, %314 : vector<8x256xf32>
    %316 = vector.extract_strided_slice %315 {offsets = [0, 0], sizes = [8, 64], strides = [1, 1]} : vector<8x256xf32> to vector<8x64xf32>
    %317 = arith.negf %316 : vector<8x64xf32>
    %318 = math.exp %317 : vector<8x64xf32>
    %cst_102 = arith.constant 1.000000e+00 : f32
    %319 = vector.broadcast %cst_102 : f32 to vector<8x64xf32>
    %320 = arith.addf %319, %318 : vector<8x64xf32>
    %321 = arith.divf %319, %320 : vector<8x64xf32>
    %322 = vector.extract_strided_slice %315 {offsets = [0, 64], sizes = [8, 64], strides = [1, 1]} : vector<8x256xf32> to vector<8x64xf32>
    %323 = arith.negf %322 : vector<8x64xf32>
    %324 = math.exp %323 : vector<8x64xf32>
    %cst_103 = arith.constant 1.000000e+00 : f32
    %325 = vector.broadcast %cst_103 : f32 to vector<8x64xf32>
    %326 = arith.addf %325, %324 : vector<8x64xf32>
    %327 = arith.divf %325, %326 : vector<8x64xf32>
    %328 = vector.extract_strided_slice %315 {offsets = [0, 128], sizes = [8, 64], strides = [1, 1]} : vector<8x256xf32> to vector<8x64xf32>
    %329 = math.tanh %328 : vector<8x64xf32>
    %330 = vector.extract_strided_slice %315 {offsets = [0, 192], sizes = [8, 64], strides = [1, 1]} : vector<8x256xf32> to vector<8x64xf32>
    %331 = arith.negf %330 : vector<8x64xf32>
    %332 = math.exp %331 : vector<8x64xf32>
    %cst_104 = arith.constant 1.000000e+00 : f32
    %333 = vector.broadcast %cst_104 : f32 to vector<8x64xf32>
    %334 = arith.addf %333, %332 : vector<8x64xf32>
    %335 = arith.divf %333, %334 : vector<8x64xf32>
    %336 = arith.mulf %327, %309 : vector<8x64xf32>
    %337 = arith.mulf %321, %329 : vector<8x64xf32>
    %338 = arith.addf %336, %337 : vector<8x64xf32>
    %339 = math.tanh %338 : vector<8x64xf32>
    %340 = arith.mulf %335, %339 : vector<8x64xf32>
    %c16_105 = arith.constant 16 : index
    %c0_106 = arith.constant 0 : index
    %341 = vector.load %arg5[%c16_105, %c0_106] : memref<64x64xf32, #tpu.memory_space<vmem>>, vector<8x64xf32>
    tpu.vector_store %arg5[%c16_105, %c0_106], %340 {strides = array<i32>} : memref<64x64xf32, #tpu.memory_space<vmem>>, vector<8x64xf32>,
    %c24_107 = arith.constant 24 : index
    %c0_108 = arith.constant 0 : index
    %342 = vector.load %arg6[%c24_107, %c0_108] : memref<64x256xf32, #tpu.memory_space<vmem>>, vector<8x256xf32>
    %cst_109 = arith.constant dense<0.000000e+00> : vector<8x256xf32>
    %343 = tpu.matmul %340, %254, %cst_109 {dimension_numbers = #tpu.dot_dimension_numbers<[1], [0], [0], [1], [0, 0, 1, 1], [], []>} : vector<8x64xf32>, vector<64x256xf32>, vector<8x256xf32> -> vector<8x256xf32>
    %344 = arith.addf %342, %343 : vector<8x256xf32>
    %345 = vector.extract_strided_slice %344 {offsets = [0, 0], sizes = [8, 64], strides = [1, 1]} : vector<8x256xf32> to vector<8x64xf32>
    %346 = arith.negf %345 : vector<8x64xf32>
    %347 = math.exp %346 : vector<8x64xf32>
    %cst_110 = arith.constant 1.000000e+00 : f32
    %348 = vector.broadcast %cst_110 : f32 to vector<8x64xf32>
    %349 = arith.addf %348, %347 : vector<8x64xf32>
    %350 = arith.divf %348, %349 : vector<8x64xf32>
    %351 = vector.extract_strided_slice %344 {offsets = [0, 64], sizes = [8, 64], strides = [1, 1]} : vector<8x256xf32> to vector<8x64xf32>
    %352 = arith.negf %351 : vector<8x64xf32>
    %353 = math.exp %352 : vector<8x64xf32>
    %cst_111 = arith.constant 1.000000e+00 : f32
    %354 = vector.broadcast %cst_111 : f32 to vector<8x64xf32>
    %355 = arith.addf %354, %353 : vector<8x64xf32>
    %356 = arith.divf %354, %355 : vector<8x64xf32>
    %357 = vector.extract_strided_slice %344 {offsets = [0, 128], sizes = [8, 64], strides = [1, 1]} : vector<8x256xf32> to vector<8x64xf32>
    %358 = math.tanh %357 : vector<8x64xf32>
    %359 = vector.extract_strided_slice %344 {offsets = [0, 192], sizes = [8, 64], strides = [1, 1]} : vector<8x256xf32> to vector<8x64xf32>
    %360 = arith.negf %359 : vector<8x64xf32>
    %361 = math.exp %360 : vector<8x64xf32>
    %cst_112 = arith.constant 1.000000e+00 : f32
    %362 = vector.broadcast %cst_112 : f32 to vector<8x64xf32>
    %363 = arith.addf %362, %361 : vector<8x64xf32>
    %364 = arith.divf %362, %363 : vector<8x64xf32>
    %365 = arith.mulf %356, %338 : vector<8x64xf32>
    %366 = arith.mulf %350, %358 : vector<8x64xf32>
    %367 = arith.addf %365, %366 : vector<8x64xf32>
    %368 = math.tanh %367 : vector<8x64xf32>
    %369 = arith.mulf %364, %368 : vector<8x64xf32>
    %c24_113 = arith.constant 24 : index
    %c0_114 = arith.constant 0 : index
    %370 = vector.load %arg5[%c24_113, %c0_114] : memref<64x64xf32, #tpu.memory_space<vmem>>, vector<8x64xf32>
    tpu.vector_store %arg5[%c24_113, %c0_114], %369 {strides = array<i32>} : memref<64x64xf32, #tpu.memory_space<vmem>>, vector<8x64xf32>,
    %c32_115 = arith.constant 32 : index
    %c0_116 = arith.constant 0 : index
    %371 = vector.load %arg6[%c32_115, %c0_116] : memref<64x256xf32, #tpu.memory_space<vmem>>, vector<8x256xf32>
    %cst_117 = arith.constant dense<0.000000e+00> : vector<8x256xf32>
    %372 = tpu.matmul %369, %254, %cst_117 {dimension_numbers = #tpu.dot_dimension_numbers<[1], [0], [0], [1], [0, 0, 1, 1], [], []>} : vector<8x64xf32>, vector<64x256xf32>, vector<8x256xf32> -> vector<8x256xf32>
    %373 = arith.addf %371, %372 : vector<8x256xf32>
    %374 = vector.extract_strided_slice %373 {offsets = [0, 0], sizes = [8, 64], strides = [1, 1]} : vector<8x256xf32> to vector<8x64xf32>
    %375 = arith.negf %374 : vector<8x64xf32>
    %376 = math.exp %375 : vector<8x64xf32>
    %cst_118 = arith.constant 1.000000e+00 : f32
    %377 = vector.broadcast %cst_118 : f32 to vector<8x64xf32>
    %378 = arith.addf %377, %376 : vector<8x64xf32>
    %379 = arith.divf %377, %378 : vector<8x64xf32>
    %380 = vector.extract_strided_slice %373 {offsets = [0, 64], sizes = [8, 64], strides = [1, 1]} : vector<8x256xf32> to vector<8x64xf32>
    %381 = arith.negf %380 : vector<8x64xf32>
    %382 = math.exp %381 : vector<8x64xf32>
    %cst_119 = arith.constant 1.000000e+00 : f32
    %383 = vector.broadcast %cst_119 : f32 to vector<8x64xf32>
    %384 = arith.addf %383, %382 : vector<8x64xf32>
    %385 = arith.divf %383, %384 : vector<8x64xf32>
    %386 = vector.extract_strided_slice %373 {offsets = [0, 128], sizes = [8, 64], strides = [1, 1]} : vector<8x256xf32> to vector<8x64xf32>
    %387 = math.tanh %386 : vector<8x64xf32>
    %388 = vector.extract_strided_slice %373 {offsets = [0, 192], sizes = [8, 64], strides = [1, 1]} : vector<8x256xf32> to vector<8x64xf32>
    %389 = arith.negf %388 : vector<8x64xf32>
    %390 = math.exp %389 : vector<8x64xf32>
    %cst_120 = arith.constant 1.000000e+00 : f32
    %391 = vector.broadcast %cst_120 : f32 to vector<8x64xf32>
    %392 = arith.addf %391, %390 : vector<8x64xf32>
    %393 = arith.divf %391, %392 : vector<8x64xf32>
    %394 = arith.mulf %385, %367 : vector<8x64xf32>
    %395 = arith.mulf %379, %387 : vector<8x64xf32>
    %396 = arith.addf %394, %395 : vector<8x64xf32>
    %397 = math.tanh %396 : vector<8x64xf32>
    %398 = arith.mulf %393, %397 : vector<8x64xf32>
    %c32_121 = arith.constant 32 : index
    %c0_122 = arith.constant 0 : index
    %399 = vector.load %arg5[%c32_121, %c0_122] : memref<64x64xf32, #tpu.memory_space<vmem>>, vector<8x64xf32>
    tpu.vector_store %arg5[%c32_121, %c0_122], %398 {strides = array<i32>} : memref<64x64xf32, #tpu.memory_space<vmem>>, vector<8x64xf32>,
    %c40_123 = arith.constant 40 : index
    %c0_124 = arith.constant 0 : index
    %400 = vector.load %arg6[%c40_123, %c0_124] : memref<64x256xf32, #tpu.memory_space<vmem>>, vector<8x256xf32>
    %cst_125 = arith.constant dense<0.000000e+00> : vector<8x256xf32>
    %401 = tpu.matmul %398, %254, %cst_125 {dimension_numbers = #tpu.dot_dimension_numbers<[1], [0], [0], [1], [0, 0, 1, 1], [], []>} : vector<8x64xf32>, vector<64x256xf32>, vector<8x256xf32> -> vector<8x256xf32>
    %402 = arith.addf %400, %401 : vector<8x256xf32>
    %403 = vector.extract_strided_slice %402 {offsets = [0, 0], sizes = [8, 64], strides = [1, 1]} : vector<8x256xf32> to vector<8x64xf32>
    %404 = arith.negf %403 : vector<8x64xf32>
    %405 = math.exp %404 : vector<8x64xf32>
    %cst_126 = arith.constant 1.000000e+00 : f32
    %406 = vector.broadcast %cst_126 : f32 to vector<8x64xf32>
    %407 = arith.addf %406, %405 : vector<8x64xf32>
    %408 = arith.divf %406, %407 : vector<8x64xf32>
    %409 = vector.extract_strided_slice %402 {offsets = [0, 64], sizes = [8, 64], strides = [1, 1]} : vector<8x256xf32> to vector<8x64xf32>
    %410 = arith.negf %409 : vector<8x64xf32>
    %411 = math.exp %410 : vector<8x64xf32>
    %cst_127 = arith.constant 1.000000e+00 : f32
    %412 = vector.broadcast %cst_127 : f32 to vector<8x64xf32>
    %413 = arith.addf %412, %411 : vector<8x64xf32>
    %414 = arith.divf %412, %413 : vector<8x64xf32>
    %415 = vector.extract_strided_slice %402 {offsets = [0, 128], sizes = [8, 64], strides = [1, 1]} : vector<8x256xf32> to vector<8x64xf32>
    %416 = math.tanh %415 : vector<8x64xf32>
    %417 = vector.extract_strided_slice %402 {offsets = [0, 192], sizes = [8, 64], strides = [1, 1]} : vector<8x256xf32> to vector<8x64xf32>
    %418 = arith.negf %417 : vector<8x64xf32>
    %419 = math.exp %418 : vector<8x64xf32>
    %cst_128 = arith.constant 1.000000e+00 : f32
    %420 = vector.broadcast %cst_128 : f32 to vector<8x64xf32>
    %421 = arith.addf %420, %419 : vector<8x64xf32>
    %422 = arith.divf %420, %421 : vector<8x64xf32>
    %423 = arith.mulf %414, %396 : vector<8x64xf32>
    %424 = arith.mulf %408, %416 : vector<8x64xf32>
    %425 = arith.addf %423, %424 : vector<8x64xf32>
    %426 = math.tanh %425 : vector<8x64xf32>
    %427 = arith.mulf %422, %426 : vector<8x64xf32>
    %c40_129 = arith.constant 40 : index
    %c0_130 = arith.constant 0 : index
    %428 = vector.load %arg5[%c40_129, %c0_130] : memref<64x64xf32, #tpu.memory_space<vmem>>, vector<8x64xf32>
    tpu.vector_store %arg5[%c40_129, %c0_130], %427 {strides = array<i32>} : memref<64x64xf32, #tpu.memory_space<vmem>>, vector<8x64xf32>,
    %c48_131 = arith.constant 48 : index
    %c0_132 = arith.constant 0 : index
    %429 = vector.load %arg6[%c48_131, %c0_132] : memref<64x256xf32, #tpu.memory_space<vmem>>, vector<8x256xf32>
    %cst_133 = arith.constant dense<0.000000e+00> : vector<8x256xf32>
    %430 = tpu.matmul %427, %254, %cst_133 {dimension_numbers = #tpu.dot_dimension_numbers<[1], [0], [0], [1], [0, 0, 1, 1], [], []>} : vector<8x64xf32>, vector<64x256xf32>, vector<8x256xf32> -> vector<8x256xf32>
    %431 = arith.addf %429, %430 : vector<8x256xf32>
    %432 = vector.extract_strided_slice %431 {offsets = [0, 0], sizes = [8, 64], strides = [1, 1]} : vector<8x256xf32> to vector<8x64xf32>
    %433 = arith.negf %432 : vector<8x64xf32>
    %434 = math.exp %433 : vector<8x64xf32>
    %cst_134 = arith.constant 1.000000e+00 : f32
    %435 = vector.broadcast %cst_134 : f32 to vector<8x64xf32>
    %436 = arith.addf %435, %434 : vector<8x64xf32>
    %437 = arith.divf %435, %436 : vector<8x64xf32>
    %438 = vector.extract_strided_slice %431 {offsets = [0, 64], sizes = [8, 64], strides = [1, 1]} : vector<8x256xf32> to vector<8x64xf32>
    %439 = arith.negf %438 : vector<8x64xf32>
    %440 = math.exp %439 : vector<8x64xf32>
    %cst_135 = arith.constant 1.000000e+00 : f32
    %441 = vector.broadcast %cst_135 : f32 to vector<8x64xf32>
    %442 = arith.addf %441, %440 : vector<8x64xf32>
    %443 = arith.divf %441, %442 : vector<8x64xf32>
    %444 = vector.extract_strided_slice %431 {offsets = [0, 128], sizes = [8, 64], strides = [1, 1]} : vector<8x256xf32> to vector<8x64xf32>
    %445 = math.tanh %444 : vector<8x64xf32>
    %446 = vector.extract_strided_slice %431 {offsets = [0, 192], sizes = [8, 64], strides = [1, 1]} : vector<8x256xf32> to vector<8x64xf32>
    %447 = arith.negf %446 : vector<8x64xf32>
    %448 = math.exp %447 : vector<8x64xf32>
    %cst_136 = arith.constant 1.000000e+00 : f32
    %449 = vector.broadcast %cst_136 : f32 to vector<8x64xf32>
    %450 = arith.addf %449, %448 : vector<8x64xf32>
    %451 = arith.divf %449, %450 : vector<8x64xf32>
    %452 = arith.mulf %443, %425 : vector<8x64xf32>
    %453 = arith.mulf %437, %445 : vector<8x64xf32>
    %454 = arith.addf %452, %453 : vector<8x64xf32>
    %455 = math.tanh %454 : vector<8x64xf32>
    %456 = arith.mulf %451, %455 : vector<8x64xf32>
    %c48_137 = arith.constant 48 : index
    %c0_138 = arith.constant 0 : index
    %457 = vector.load %arg5[%c48_137, %c0_138] : memref<64x64xf32, #tpu.memory_space<vmem>>, vector<8x64xf32>
    tpu.vector_store %arg5[%c48_137, %c0_138], %456 {strides = array<i32>} : memref<64x64xf32, #tpu.memory_space<vmem>>, vector<8x64xf32>,
    %c56_139 = arith.constant 56 : index
    %c0_140 = arith.constant 0 : index
    %458 = vector.load %arg6[%c56_139, %c0_140] : memref<64x256xf32, #tpu.memory_space<vmem>>, vector<8x256xf32>
    %cst_141 = arith.constant dense<0.000000e+00> : vector<8x256xf32>
    %459 = tpu.matmul %456, %254, %cst_141 {dimension_numbers = #tpu.dot_dimension_numbers<[1], [0], [0], [1], [0, 0, 1, 1], [], []>} : vector<8x64xf32>, vector<64x256xf32>, vector<8x256xf32> -> vector<8x256xf32>
    %460 = arith.addf %458, %459 : vector<8x256xf32>
    %461 = vector.extract_strided_slice %460 {offsets = [0, 0], sizes = [8, 64], strides = [1, 1]} : vector<8x256xf32> to vector<8x64xf32>
    %462 = arith.negf %461 : vector<8x64xf32>
    %463 = math.exp %462 : vector<8x64xf32>
    %cst_142 = arith.constant 1.000000e+00 : f32
    %464 = vector.broadcast %cst_142 : f32 to vector<8x64xf32>
    %465 = arith.addf %464, %463 : vector<8x64xf32>
    %466 = arith.divf %464, %465 : vector<8x64xf32>
    %467 = vector.extract_strided_slice %460 {offsets = [0, 64], sizes = [8, 64], strides = [1, 1]} : vector<8x256xf32> to vector<8x64xf32>
    %468 = arith.negf %467 : vector<8x64xf32>
    %469 = math.exp %468 : vector<8x64xf32>
    %cst_143 = arith.constant 1.000000e+00 : f32
    %470 = vector.broadcast %cst_143 : f32 to vector<8x64xf32>
    %471 = arith.addf %470, %469 : vector<8x64xf32>
    %472 = arith.divf %470, %471 : vector<8x64xf32>
    %473 = vector.extract_strided_slice %460 {offsets = [0, 128], sizes = [8, 64], strides = [1, 1]} : vector<8x256xf32> to vector<8x64xf32>
    %474 = math.tanh %473 : vector<8x64xf32>
    %475 = vector.extract_strided_slice %460 {offsets = [0, 192], sizes = [8, 64], strides = [1, 1]} : vector<8x256xf32> to vector<8x64xf32>
    %476 = arith.negf %475 : vector<8x64xf32>
    %477 = math.exp %476 : vector<8x64xf32>
    %cst_144 = arith.constant 1.000000e+00 : f32
    %478 = vector.broadcast %cst_144 : f32 to vector<8x64xf32>
    %479 = arith.addf %478, %477 : vector<8x64xf32>
    %480 = arith.divf %478, %479 : vector<8x64xf32>
    %481 = arith.mulf %472, %454 : vector<8x64xf32>
    %482 = arith.mulf %466, %474 : vector<8x64xf32>
    %483 = arith.addf %481, %482 : vector<8x64xf32>
    %484 = math.tanh %483 : vector<8x64xf32>
    %485 = arith.mulf %480, %484 : vector<8x64xf32>
    %c56_145 = arith.constant 56 : index
    %c0_146 = arith.constant 0 : index
    %486 = vector.load %arg5[%c56_145, %c0_146] : memref<64x64xf32, #tpu.memory_space<vmem>>, vector<8x64xf32>
    tpu.vector_store %arg5[%c56_145, %c0_146], %485 {strides = array<i32>} : memref<64x64xf32, #tpu.memory_space<vmem>>, vector<8x64xf32>,
    return
  }
  func.func @transform_0(%arg0: i32) -> (i32, i32) {
    %c0_i32 = arith.constant 0 : i32
    %c0_i32_0 = arith.constant 0 : i32
    %c0_i32_1 = arith.constant 0 : i32
    return %c0_i32, %c0_i32_0 : i32, i32
  }
  func.func @transform_1(%arg0: i32) -> (i32, i32, i32) {
    %c0_i32 = arith.constant 0 : i32
    %c0_i32_0 = arith.constant 0 : i32
    %c0_i32_1 = arith.constant 0 : i32
    %c0_i32_2 = arith.constant 0 : i32
    return %c0_i32, %c0_i32_0, %c0_i32_1 : i32, i32, i32
  }
  func.func @transform_2(%arg0: i32) -> (i32, i32, i32) {
    %c0_i32 = arith.constant 0 : i32
    %c0_i32_0 = arith.constant 0 : i32
    %c0_i32_1 = arith.constant 0 : i32
    %c0_i32_2 = arith.constant 0 : i32
    return %c0_i32, %c0_i32_0, %c0_i32_1 : i32, i32, i32
  }
  func.func @transform_3(%arg0: i32) -> (i32, i32, i32) {
    %c0_i32 = arith.constant 0 : i32
    %c0_i32_0 = arith.constant 0 : i32
    %c0_i32_1 = arith.constant 0 : i32
    %c0_i32_2 = arith.constant 0 : i32
    return %c0_i32, %c0_i32_0, %c0_i32_1 : i32, i32, i32
  }
  func.func @transform_4(%arg0: i32) -> (i32, i32) {
    %c0_i32 = arith.constant 0 : i32
    %c0_i32_0 = arith.constant 0 : i32
    %c0_i32_1 = arith.constant 0 : i32
    return %c0_i32, %c0_i32_0 : i32, i32
  }
}

</mosaic_0001>

<bundles_post_ra>
// kernel: bilstm_forward.1
= control target key start
LH: loop header
LB: loop body
LE: loop exit
PB: predicated region body
PF: predicated region fallthrough
CT: control target
= control target key end

     0   :  { %v2387_v3 = vmov 0.0   ;;  %vm53_vm0 = vcmask 523264   ;;  %v43_v34 = vlaneseq  ;;  %s2388_s5 = smov 64   ;;  %s3262_s1 = inlined_call_operand.vmem [shape: f32[2,64,256], index: 1, kind: input, shape index: {}]   ;;  %s3263_s2 = inlined_call_operand.vmem [shape: f32[2,64,256], index: 2, kind: input, shape index: {}]   ;;  %s3264_s0 = inlined_call_operand.vmem [shape: f32[64,64], index: 0, kind: input, shape index: {}]   ;;  %s3265_s3 = inlined_call_operand.vmem [shape: f32[2,1,256], index: 3, kind: input, shape index: {}]   ;;  %s3266_s4 = inlined_call_operand.vmem [shape: f32[64,64], index: 4, kind: output, shape index: {}]  }
   0x1   :  { %v40_v0 = vld [vmem:[%s3262_s1 + $0x78] sm:$0xff]  ;;  %v39_v2 = vld [vmem:[%s3262_s1 + $0x70] sm:$0xff]  ;;  %142 = vmatprep.mubr.f32.mxu0 %v2387_v3  ;;  %292 = vmatprep.mubr.f32.mxu1 %v2387_v3  ;;  %v38_v5 = vld [vmem:[%s3262_s1 + $0x68] sm:$0xff] }
   0x2   :  { %v2420_v1 = vld [vmem:[%s3263_s2 + $0x78] sm:$0xff]  ;;  %94 = vmatprep.subr.mxu0 %v40_v0  ;;  %v2431_v4 = vld [vmem:[%s3263_s2 + $0x70] sm:$0xff]  ;;  %v2439_v6 = vld [vmem:[%s3263_s2 + $0x68] sm:$0xff]  ;;  %v2601_v35 = vshrl.u32 %v43_v34, 7 }
   0x3   :  { %244 = vmatprep.subr.mxu1 %v2420_v1  ;;  %95 = vmatpush1.msra.mxu0 %v39_v2  ;;  %v37_v7 = vld [vmem:[%s3262_s1 + $0x60] sm:$0xff]  ;;  %v36_v9 = vld [vmem:[%s3262_s1 + $0x58] sm:$0xff]  ;;  %v35_v11 = vld [vmem:[%s3262_s1 + $0x50] sm:$0xff] }
   0x4   :  { %245 = vmatpush1.msra.mxu1 %v2431_v4  ;;  %v2448_v8 = vld [vmem:[%s3263_s2 + $0x60] sm:$0xff]  ;;  %96 = vmatprep.subr.mxu0 %v38_v5  ;;  %v2457_v10 = vld [vmem:[%s3263_s2 + $0x58] sm:$0xff]  ;;  %v2465_v12 = vld [vmem:[%s3263_s2 + $0x50] sm:$0xff]  ;;  %v45_v36 = vsub.s32 0, %v2601_v35  ;;  %v49_v44 = vsub.s32 1, %v2601_v35 }
   0x5   :  { %246 = vmatprep.subr.mxu1 %v2439_v6  ;;  %97 = vmatpush1.msra.mxu0 %v37_v7  ;;  %v34_v13 = vld [vmem:[%s3262_s1 + $0x48] sm:$0xff]  ;;  %v33_v15 = vld [vmem:[%s3262_s1 + $0x40] sm:$0xff]  ;;  %v32_v17 = vld [vmem:[%s3262_s1 + $0x38] sm:$0xff] }
   0x6   :  { %247 = vmatpush1.msra.mxu1 %v2448_v8  ;;  %v2474_v14 = vld [vmem:[%s3263_s2 + $0x48] sm:$0xff]  ;;  %98 = vmatprep.subr.mxu0 %v36_v9  ;;  %v2483_v16 = vld [vmem:[%s3263_s2 + $0x40] sm:$0xff]  ;;  %v2492_v18 = vld [vmem:[%s3263_s2 + $0x38] sm:$0xff] }
   0x7   :  { %248 = vmatprep.subr.mxu1 %v2457_v10  ;;  %99 = vmatpush1.msra.mxu0 %v35_v11  ;;  %v31_v19 = vld [vmem:[%s3262_s1 + $0x30] sm:$0xff]  ;;  %v30_v21 = vld [vmem:[%s3262_s1 + $0x28] sm:$0xff]  ;;  %v29_v23 = vld [vmem:[%s3262_s1 + $0x20] sm:$0xff] }
   0x8   :  { %249 = vmatpush1.msra.mxu1 %v2465_v12  ;;  %100 = vmatprep.subr.mxu0 %v34_v13  ;;  %v2501_v20 = vld [vmem:[%s3263_s2 + $0x30] sm:$0xff]  ;;  %v2510_v22 = vld [vmem:[%s3263_s2 + $0x28] sm:$0xff]  ;;  %v2519_v24 = vld [vmem:[%s3263_s2 + $0x20] sm:$0xff] }
   0x9   :  { %250 = vmatprep.subr.mxu1 %v2474_v14  ;;  %101 = vmatpush1.msra.mxu0 %v33_v15  ;;  %v28_v25 = vld [vmem:[%s3262_s1 + $0x18] sm:$0xff]  ;;  %v27_v27 = vld [vmem:[%s3262_s1 + $0x10] sm:$0xff]  ;;  %v26_v29 = vld [vmem:[%s3262_s1 + $0x8] sm:$0xff] }
   0xa   :  { %251 = vmatpush1.msra.mxu1 %v2483_v16  ;;  %102 = vmatprep.subr.mxu0 %v32_v17  ;;  %v2528_v26 = vld [vmem:[%s3263_s2 + $0x18] sm:$0xff]  ;;  %v2537_v28 = vld [vmem:[%s3263_s2 + $0x10] sm:$0xff]  ;;  %v2546_v30 = vld [vmem:[%s3263_s2 + $0x8] sm:$0xff] }
   0xb   :  { %252 = vmatprep.subr.mxu1 %v2492_v18  ;;  %103 = vmatpush1.msra.mxu0 %v31_v19  ;;  %v25_v31 = vld [vmem:[%s3262_s1] sm:$0xff]  ;;  %v18_v55 = vld [vmem:[%s3264_s0 + $0x8] sm:$0xff]  ;;  %v20_v34 = vld [vmem:[%s3264_s0 + $0x18] sm:$0xff] }
   0xc   :  { %253 = vmatpush1.msra.mxu1 %v2501_v20  ;;  %104 = vmatprep.subr.mxu0 %v30_v21  ;;  %v2555_v32 = vld [vmem:[%s3263_s2] sm:$0xff] }
   0xd   :  { %254 = vmatprep.subr.mxu1 %v2510_v22  ;;  %105 = vmatpush1.msra.mxu0 %v29_v23  ;;  %v17_v33 = vld [vmem:[%s3264_s0] sm:$0xff] }
   0xe   :  { %255 = vmatpush1.msra.mxu1 %v2519_v24  ;;  %106 = vmatprep.subr.mxu0 %v28_v25  ;;  %v41_v37 = vld [vmem:[%s3265_s3] sm:$0x3] }
   0xf   :  { %256 = vmatprep.subr.mxu1 %v2528_v26  ;;  %107 = vmatpush1.msra.mxu0 %v27_v27  ;;  %v2609_v38 = vrot.slane %v41_v37, %v45_v36  ;;  %v2615_v45 = vrot.slane %v41_v37, %v49_v44  ;;  %v21_v37 = vld [vmem:[%s3264_s0 + $0x20] sm:$0xff] }
  0x10   :  { %257 = vmatpush1.msra.mxu1 %v2537_v28  ;;  %108 = vmatprep.subr.mxu0 %v26_v29 }
  0x11   :  { %258 = vmatprep.subr.mxu1 %v2546_v30  ;;  %109 = vmatpush1.msra.mxu0 %v25_v31 }
  0x12   :  { %259 = vmatpush1.msra.mxu1 %v2555_v32  ;;  %2098 = vmatmul.mubr.msk.f32.vlgmr.msra.gmra.mxu0 %vm53_vm0, %v17_v33  ;;  %v19_v33 = vld [vmem:[%s3264_s0 + $0x10] sm:$0xff] }
  0x13   :  { %293 = vmatmul.mubr.f32.vlgmr.msra.gmra.mxu1 %v2387_v3  ;;  %348 = vmatprep.subr.mxu1 %v2420_v1 }
  0x14   :  { %148 = vmatprep.mubr.f32.mxu0 %v2387_v3  ;;  %349 = vmatpush1.msra.mxu1 %v2431_v4 }
  0x15   :  { %396 = vmatprep.mubr.f32.mxu1 %v2387_v3  ;;  %350 = vmatprep.subr.mxu1 %v2439_v6 }
  0x16   :  { %452 = vmatprep.subr.mxu0 %v2420_v1  ;;  %351 = vmatpush1.msra.mxu1 %v2448_v8 }
  0x17   :  { %453 = vmatpush1.msra.mxu0 %v2431_v4  ;;  %352 = vmatprep.subr.mxu1 %v2457_v10 }
  0x18   :  { %454 = vmatprep.subr.mxu0 %v2439_v6  ;;  %353 = vmatpush1.msra.mxu1 %v2465_v12 }
  0x19   :  { %455 = vmatpush1.msra.mxu0 %v2448_v8  ;;  %354 = vmatprep.subr.mxu1 %v2474_v14 }
  0x1a   :  { %456 = vmatprep.subr.mxu0 %v2457_v10  ;;  %355 = vmatpush1.msra.mxu1 %v2483_v16 }
  0x1b   :  { %457 = vmatpush1.msra.mxu0 %v2465_v12  ;;  %356 = vmatprep.subr.mxu1 %v2492_v18 }
  0x1c   :  { %458 = vmatprep.subr.mxu0 %v2474_v14  ;;  %357 = vmatpush1.msra.mxu1 %v2501_v20 }
  0x1d   :  { %459 = vmatpush1.msra.mxu0 %v2483_v16  ;;  %358 = vmatprep.subr.mxu1 %v2510_v22 }
  0x1e   :  { %460 = vmatprep.subr.mxu0 %v2492_v18  ;;  %359 = vmatpush1.msra.mxu1 %v2519_v24 }
  0x1f   :  { %461 = vmatpush1.msra.mxu0 %v2501_v20  ;;  %360 = vmatprep.subr.mxu1 %v2528_v26 }
  0x20   :  { %462 = vmatprep.subr.mxu0 %v2510_v22  ;;  %361 = vmatpush1.msra.mxu1 %v2537_v28 }
  0x21   :  { %463 = vmatpush1.msra.mxu0 %v2519_v24  ;;  %362 = vmatprep.subr.mxu1 %v2546_v30 }
  0x22   :  { %464 = vmatprep.subr.mxu0 %v2528_v26  ;;  %363 = vmatpush1.msra.mxu1 %v2555_v32 }
  0x23   :  { %465 = vmatpush1.msra.mxu0 %v2537_v28  ;;  %556 = vmatprep.subr.mxu1 %v2420_v1 }
  0x24   :  { %466 = vmatprep.subr.mxu0 %v2546_v30  ;;  %2099 = vmatmul.mubr.msk.f32.gmra.mxu0 %vm53_vm0, %v18_v55 }
  0x25   :  { %467 = vmatpush1.msra.mxu0 %v2555_v32  ;;  %154 = vmatprep.mubr.f32.mxu0 %v2387_v3 }
  0x26   :  { %660 = vmatprep.subr.mxu0 %v2420_v1 }
  0x28   :  { %2100 = vmatmul.mubr.msk.f32.gmra.mxu0 %vm53_vm0, %v19_v33 }
  0x29   :  { %160 = vmatprep.mubr.f32.mxu0 %v2387_v3 }
  0x2c   :  { %2101 = vmatmul.mubr.msk.f32.gmra.mxu0 %vm53_vm0, %v20_v34 }
  0x2d   :  { %166 = vmatprep.mubr.f32.mxu0 %v2387_v3 }
  0x30   :  { %2102 = vmatmul.mubr.msk.f32.gmra.mxu0 %vm53_vm0, %v21_v37 }
  0x31   :  { %172 = vmatprep.mubr.f32.mxu0 %v2387_v3 }
  0xd2   :  { %v144_v39 = vpop.f32.mrf.mxu0 }
  0xd3   :  { %v145_v40 = vadd.f32 %v144_v39, %v2609_v38  ;;  %v294_v41 = vpop.f32.mrf.mxu1  ;;  %v22_v39 = vld [vmem:[%s3264_s0 + $0x28] sm:$0xff] }
  0xd4   :  { %v146_v46 = vpop.f32.mrf.mxu0  ;;  %2103 = vmatmul.mubr.msk.f32.gmra.mxu0 %vm53_vm0, %v22_v39 }
  0xd5   :  { %v299_v42 = vadd.f32 %v294_v41, %v145_v40  ;;  %v147_v47 = vadd.f32 %v146_v46, %v2615_v45  ;;  %v296_v48 = vpop.f32.mrf.mxu1  ;;  %178 = vmatprep.mubr.f32.mxu0 %v2387_v3  ;;  %v23_v40 = vld [vmem:[%s3264_s0 + $0x30] sm:$0xff]  ;;  %v24_v41 = vld [vmem:[%s3264_s0 + $0x38] sm:$0xff] }
  0xd7   :  { %v2106_v43 = vmul.f32 -1.442695, %v299_v42  ;;  %v300_v49 = vadd.f32 %v296_v48, %v147_v47 }
  0xd8   :  { %2104 = vmatmul.mubr.msk.f32.gmra.mxu0 %vm53_vm0, %v23_v40 }
  0xd9   :  { %2195 = vpow2.f32 %v2106_v43  ;;  %v2107_v56 = vmul.f32 -1.442695, %v300_v49  ;;  %184 = vmatprep.mubr.f32.mxu0 %v2387_v3 }
  0xda   :  { %2197 = vtanh.f32 %v300_v49 }
  0xdc   :  { %2105 = vmatmul.mubr.msk.f32.gmra.mxu0 %vm53_vm0, %v24_v41 }
  0xdd   :  { %500 = vmatprep.mubr.f32.mxu0 %v2387_v3 }
  0xe4   :  { %v150_v5 = vpop.f32.mrf.mxu0 }
  0xe5   :  { %v151_v7 = vadd.f32 %v150_v5, %v2609_v38 }
  0xe6   :  { %v2196_v50 = vpop.eup %2195  ;;  %v152_v15 = vpop.f32.mrf.mxu0 }
  0xe7   :  { %v304_v51 = vadd.f32 1.0, %v2196_v50  ;;  %v2198_v52 = vpop.eup %2197  ;;  %v153_v19 = vadd.f32 %v152_v15, %v2615_v45 }
  0xe9   :  { %2199 = vrcp.f32 %v304_v51 }
  0xea   :  { %2201 = vpow2.f32 %v2107_v56 }
  0xf6   :  { %v2200_v53 = vpop.eup %2199 }
  0xf7   :  { %v315_v54 = vmul.f32 %v2200_v53, %v2198_v52  ;;  %v2202_v57 = vpop.eup %2201  ;;  %v314_v59 = vmul.f32 0.0, %v2200_v53 }
  0xf8   :  { %v311_v58 = vadd.f32 1.0, %v2202_v57 }
  0xf9   :  { %317 = vrot.lane.b32.xlu0 %v315_v54, %s2388_s5  ;;  %v156_v54 = vpop.f32.mrf.mxu0 }
  0xfa   :  { %2203 = vrcp.f32 %v311_v58  ;;  %v157_v5 = vadd.f32 %v156_v54, %v2609_v38 }
  0xfb   :  { %v158_v55 = vpop.f32.mrf.mxu0 }
  0xfc   :  { %v159_v15 = vadd.f32 %v158_v55, %v2615_v45 }
  0xfd   :  { %v162_v56 = vpop.f32.mrf.mxu0 }
  0xff   :  { %v2707_v57 = vpop.f32.mrf.mxu0 }
 0x101   :  { %v2709_v58 = vpop.f32.mrf.mxu0 }
 0x107   :  { %v2204_v62 = vpop.eup %2203 }
 0x16b   :  { %v318_v60 = vpop.permute.xlu0 %317 }
 0x16c   :  { %v2624_v61 = vadd.f32 %v318_v60, %v314_v59  ;;  %v2711_v59 = vpop.f32.mrf.mxu0 }
 0x16e   :  { %2205 = vtanh.f32 %v2624_v61 }
 0x17b   :  { %v2206_v63 = vpop.eup %2205 }
 0x17c   :  { %v322_v0 = vmul.f32 %v2206_v63, %v2204_v62 }
 0x17e   :  { %324 = vrot.lane.b32.xlu0 %v322_v0, %s2388_s5 }
 0x194   :  { %v2713_v60 = vpop.f32.mrf.mxu0 }
 0x1f0   :  { %v325_v2 = vpop.permute.xlu0 %324 }
 0x1f1   :  { %327 = vst.msk [vmem:[%s3266_s4] sm:$0xff] %vm53_vm0, %v325_v2  ;;  %2108 = vmatmul.mubr.msk.f32.vlgmr.msra.gmra.mxu1 %vm53_vm0, %v325_v2 }
 0x1f2   :  { %557 = vmatpush1.msra.mxu1 %v2431_v4  ;;  %604 = vmatprep.mubr.f32.mxu1 %v2387_v3 }
 0x1f3   :  { %558 = vmatprep.subr.mxu1 %v2439_v6 }
 0x1f4   :  { %559 = vmatpush1.msra.mxu1 %v2448_v8 }
 0x1f5   :  { %560 = vmatprep.subr.mxu1 %v2457_v10 }
 0x1f6   :  { %561 = vmatpush1.msra.mxu1 %v2465_v12 }
 0x1f7   :  { %562 = vmatprep.subr.mxu1 %v2474_v14 }
 0x1f8   :  { %563 = vmatpush1.msra.mxu1 %v2483_v16 }
 0x1f9   :  { %564 = vmatprep.subr.mxu1 %v2492_v18 }
 0x1fa   :  { %565 = vmatpush1.msra.mxu1 %v2501_v20 }
 0x1fb   :  { %566 = vmatprep.subr.mxu1 %v2510_v22 }
 0x1fc   :  { %567 = vmatpush1.msra.mxu1 %v2519_v24 }
 0x1fd   :  { %568 = vmatprep.subr.mxu1 %v2528_v26 }
 0x1fe   :  { %569 = vmatpush1.msra.mxu1 %v2537_v28 }
 0x1ff   :  { %570 = vmatprep.subr.mxu1 %v2546_v30 }
 0x200   :  { %571 = vmatpush1.msra.mxu1 %v2555_v32 }
 0x201   :  { %764 = vmatprep.subr.mxu1 %v2420_v1 }
 0x2b1   :  { %v398_v9 = vpop.f32.mrf.mxu1 }
 0x2b2   :  { %v403_v11 = vadd.f32 %v398_v9, %v151_v7 }
 0x2b3   :  { %v400_v17 = vpop.f32.mrf.mxu1 }
 0x2b4   :  { %v2109_v13 = vmul.f32 -1.442695, %v403_v11  ;;  %v404_v21 = vadd.f32 %v400_v17, %v153_v19 }
 0x2b6   :  { %2207 = vpow2.f32 %v2109_v13  ;;  %v2110_v42 = vmul.f32 -1.442695, %v404_v21 }
 0x2b7   :  { %2209 = vtanh.f32 %v404_v21 }
 0x2c3   :  { %v2208_v23 = vpop.eup %2207 }
 0x2c4   :  { %v408_v25 = vadd.f32 1.0, %v2208_v23  ;;  %v2210_v27 = vpop.eup %2209 }
 0x2c6   :  { %2211 = vrcp.f32 %v408_v25 }
 0x2c7   :  { %2213 = vpow2.f32 %v2110_v42 }
 0x2d3   :  { %v2212_v29 = vpop.eup %2211 }
 0x2d4   :  { %v419_v31 = vmul.f32 %v2212_v29, %v2210_v27  ;;  %v2214_v43 = vpop.eup %2213  ;;  %v418_v47 = vmul.f32 %v2212_v29, %v2624_v61  ;;  %v2715_v61 = vpop.f32.mrf.mxu0 }
 0x2d5   :  { %v415_v46 = vadd.f32 1.0, %v2214_v43 }
 0x2d6   :  { %421 = vrot.lane.b32.xlu1 %v419_v31, %s2388_s5  ;;  %v2717_v62 = vpop.f32.mrf.mxu0 }
 0x2d7   :  { %2215 = vrcp.f32 %v415_v46  ;;  %v163_v46 = vadd.f32 %v162_v56, %v2609_v38 }
 0x2d8   :  { %v2719_v63 = vpop.f32.mrf.mxu0 }
 0x2da   :  { %v2721_v0 = vpop.f32.mrf.mxu0 }
 0x2dc   :  { %v2723_v2 = vpop.f32.mrf.mxu0 }
 0x2e4   :  { %v2216_v50 = vpop.eup %2215 }
 0x348   :  { %v422_v48 = vpop.permute.xlu1 %421 }
 0x349   :  { %v424_v49 = vadd.f32 %v422_v48, %v418_v47 }
 0x34b   :  { %2217 = vtanh.f32 %v424_v49 }
 0x358   :  { %v2218_v51 = vpop.eup %2217 }
 0x359   :  { %v426_v52 = vmul.f32 %v2218_v51, %v2216_v50  ;;  %v165_v51 = vadd.f32 %v2707_v57, %v2615_v45 }
 0x35b   :  { %428 = vrot.lane.b32.xlu1 %v426_v52, %s2388_s5 }
 0x3cd   :  { %v429_v53 = vpop.permute.xlu1 %428 }
 0x3ce   :  { %431 = vst.msk [vmem:[%s3266_s4 + $0x8] sm:$0xff] %vm53_vm0, %v429_v53  ;;  %2111 = vmatmul.mubr.msk.f32.vlgmr.msra.gmra.mxu0 %vm53_vm0, %v429_v53 }
 0x3cf   :  { %661 = vmatpush1.msra.mxu0 %v2431_v4  ;;  %708 = vmatprep.mubr.f32.mxu0 %v2387_v3 }
 0x3d0   :  { %662 = vmatprep.subr.mxu0 %v2439_v6 }
 0x3d1   :  { %663 = vmatpush1.msra.mxu0 %v2448_v8 }
 0x3d2   :  { %664 = vmatprep.subr.mxu0 %v2457_v10 }
 0x3d3   :  { %665 = vmatpush1.msra.mxu0 %v2465_v12 }
 0x3d4   :  { %666 = vmatprep.subr.mxu0 %v2474_v14 }
 0x3d5   :  { %667 = vmatpush1.msra.mxu0 %v2483_v16 }
 0x3d6   :  { %668 = vmatprep.subr.mxu0 %v2492_v18 }
 0x3d7   :  { %669 = vmatpush1.msra.mxu0 %v2501_v20 }
 0x3d8   :  { %670 = vmatprep.subr.mxu0 %v2510_v22 }
 0x3d9   :  { %671 = vmatpush1.msra.mxu0 %v2519_v24 }
 0x3da   :  { %672 = vmatprep.subr.mxu0 %v2528_v26 }
 0x3db   :  { %673 = vmatpush1.msra.mxu0 %v2537_v28 }
 0x3dc   :  { %674 = vmatprep.subr.mxu0 %v2546_v30 }
 0x3dd   :  { %675 = vmatpush1.msra.mxu0 %v2555_v32 }
 0x3de   :  { %868 = vmatprep.subr.mxu0 %v2420_v1 }
 0x48e   :  { %v502_v7 = vpop.f32.mrf.mxu0 }
 0x48f   :  { %v507_v9 = vadd.f32 %v502_v7, %v157_v5 }
 0x490   :  { %v504_v13 = vpop.f32.mrf.mxu0 }
 0x491   :  { %v2112_v11 = vmul.f32 -1.442695, %v507_v9  ;;  %v508_v17 = vadd.f32 %v504_v13, %v159_v15 }
 0x493   :  { %2219 = vpow2.f32 %v2112_v11  ;;  %v2113_v29 = vmul.f32 -1.442695, %v508_v17 }
 0x494   :  { %2221 = vtanh.f32 %v508_v17 }
 0x4a0   :  { %v2220_v19 = vpop.eup %2219 }
 0x4a1   :  { %v512_v21 = vadd.f32 1.0, %v2220_v19  ;;  %v2222_v23 = vpop.eup %2221 }
 0x4a3   :  { %2223 = vrcp.f32 %v512_v21 }
 0x4a4   :  { %2225 = vpow2.f32 %v2113_v29 }
 0x4b0   :  { %v2224_v25 = vpop.eup %2223 }
 0x4b1   :  { %v523_v27 = vmul.f32 %v2224_v25, %v2222_v23  ;;  %v2226_v31 = vpop.eup %2225  ;;  %v522_v34 = vmul.f32 %v2224_v25, %v424_v49  ;;  %v169_v23 = vadd.f32 %v2709_v58, %v2609_v38 }
 0x4b2   :  { %v519_v33 = vadd.f32 1.0, %v2226_v31 }
 0x4b3   :  { %525 = vrot.lane.b32.xlu0 %v523_v27, %s2388_s5 }
 0x4b4   :  { %2227 = vrcp.f32 %v519_v33  ;;  %v171_v33 = vadd.f32 %v2711_v59, %v2615_v45 }
 0x4c1   :  { %v2228_v40 = vpop.eup %2227 }
 0x525   :  { %v526_v37 = vpop.permute.xlu0 %525 }
 0x526   :  { %v528_v39 = vadd.f32 %v526_v37, %v522_v34 }
 0x528   :  { %2229 = vtanh.f32 %v528_v39 }
 0x535   :  { %v2230_v41 = vpop.eup %2229 }
 0x536   :  { %v530_v42 = vmul.f32 %v2230_v41, %v2228_v40 }
 0x538   :  { %532 = vrot.lane.b32.xlu1 %v530_v42, %s2388_s5 }
 0x5aa   :  { %v533_v43 = vpop.permute.xlu1 %532 }
 0x5ab   :  { %535 = vst.msk [vmem:[%s3266_s4 + $0x10] sm:$0xff] %vm53_vm0, %v533_v43  ;;  %2114 = vmatmul.mubr.msk.f32.vlgmr.msra.gmra.mxu1 %vm53_vm0, %v533_v43 }
 0x5ac   :  { %765 = vmatpush1.msra.mxu1 %v2431_v4  ;;  %812 = vmatprep.mubr.f32.mxu1 %v2387_v3 }
 0x5ad   :  { %766 = vmatprep.subr.mxu1 %v2439_v6 }
 0x5ae   :  { %767 = vmatpush1.msra.mxu1 %v2448_v8 }
 0x5af   :  { %768 = vmatprep.subr.mxu1 %v2457_v10 }
 0x5b0   :  { %769 = vmatpush1.msra.mxu1 %v2465_v12 }
 0x5b1   :  { %770 = vmatprep.subr.mxu1 %v2474_v14 }
 0x5b2   :  { %771 = vmatpush1.msra.mxu1 %v2483_v16 }
 0x5b3   :  { %772 = vmatprep.subr.mxu1 %v2492_v18 }
 0x5b4   :  { %773 = vmatpush1.msra.mxu1 %v2501_v20 }
 0x5b5   :  { %774 = vmatprep.subr.mxu1 %v2510_v22 }
 0x5b6   :  { %775 = vmatpush1.msra.mxu1 %v2519_v24 }
 0x5b7   :  { %776 = vmatprep.subr.mxu1 %v2528_v26 }
 0x5b8   :  { %777 = vmatpush1.msra.mxu1 %v2537_v28 }
 0x5b9   :  { %778 = vmatprep.subr.mxu1 %v2546_v30 }
 0x5ba   :  { %779 = vmatpush1.msra.mxu1 %v2555_v32 }
 0x5bb   :  { %972 = vmatprep.subr.mxu1 %v2420_v1 }
 0x66b   :  { %v606_v47 = vpop.f32.mrf.mxu1 }
 0x66c   :  { %v611_v48 = vadd.f32 %v606_v47, %v163_v46 }
 0x66d   :  { %v608_v50 = vpop.f32.mrf.mxu1 }
 0x66e   :  { %v2115_v49 = vmul.f32 -1.442695, %v611_v48  ;;  %v612_v52 = vadd.f32 %v608_v50, %v165_v51 }
 0x670   :  { %2231 = vpow2.f32 %v2115_v49  ;;  %v2116_v1 = vmul.f32 -1.442695, %v612_v52 }
 0x671   :  { %2233 = vtanh.f32 %v612_v52 }
 0x67d   :  { %v2232_v53 = vpop.eup %2231 }
 0x67e   :  { %v616_v54 = vadd.f32 1.0, %v2232_v53  ;;  %v2234_v55 = vpop.eup %2233 }
 0x680   :  { %2235 = vrcp.f32 %v616_v54 }
 0x681   :  { %2237 = vpow2.f32 %v2116_v1  ;;  %v2143_v1 = vld [vmem:[%s3262_s1 + $0xf0] sm:$0xff] }
 0x68d   :  { %v2236_v5 = vpop.eup %2235 }
 0x68e   :  { %v627_v7 = vmul.f32 %v2236_v5, %v2234_v55  ;;  %v2238_v56 = vpop.eup %2237  ;;  %v626_v11 = vmul.f32 %v2236_v5, %v528_v39 }
 0x68f   :  { %v623_v9 = vadd.f32 1.0, %v2238_v56 }
 0x690   :  { %629 = vrot.lane.b32.xlu0 %v627_v7, %s2388_s5 }
 0x691   :  { %2239 = vrcp.f32 %v623_v9  ;;  %v2142_v9 = vld [vmem:[%s3262_s1 + $0xe8] sm:$0xff] }
 0x69e   :  { %v2240_v57 = vpop.eup %2239 }
 0x702   :  { %v630_v13 = vpop.permute.xlu0 %629 }
 0x703   :  { %v632_v15 = vadd.f32 %v630_v13, %v626_v11  ;;  %v2141_v11 = vld [vmem:[%s3262_s1 + $0xe0] sm:$0xff]  ;;  %v2140_v13 = vld [vmem:[%s3262_s1 + $0xd8] sm:$0xff] }
 0x705   :  { %2241 = vtanh.f32 %v632_v15 }
 0x712   :  { %v2242_v17 = vpop.eup %2241 }
 0x713   :  { %v634_v19 = vmul.f32 %v2242_v17, %v2240_v57  ;;  %v2138_v57 = vld [vmem:[%s3262_s1 + $0xc8] sm:$0xff]  ;;  %v2137_v17 = vld [vmem:[%s3262_s1 + $0xc0] sm:$0xff] }
 0x715   :  { %636 = vrot.lane.b32.xlu1 %v634_v19, %s2388_s5  ;;  %v2136_v19 = vld [vmem:[%s3262_s1 + $0xb8] sm:$0xff] }
 0x787   :  { %v637_v21 = vpop.permute.xlu1 %636 }
 0x788   :  { %639 = vst.msk [vmem:[%s3266_s4 + $0x18] sm:$0xff] %vm53_vm0, %v637_v21  ;;  %2117 = vmatmul.mubr.msk.f32.vlgmr.msra.gmra.mxu0 %vm53_vm0, %v637_v21  ;;  %v2135_v21 = vld [vmem:[%s3262_s1 + $0xb0] sm:$0xff] }
 0x789   :  { %869 = vmatpush1.msra.mxu0 %v2431_v4  ;;  %916 = vmatprep.mubr.f32.mxu0 %v2387_v3 }
 0x78a   :  { %870 = vmatprep.subr.mxu0 %v2439_v6 }
 0x78b   :  { %871 = vmatpush1.msra.mxu0 %v2448_v8 }
 0x78c   :  { %872 = vmatprep.subr.mxu0 %v2457_v10 }
 0x78d   :  { %873 = vmatpush1.msra.mxu0 %v2465_v12 }
 0x78e   :  { %874 = vmatprep.subr.mxu0 %v2474_v14 }
 0x78f   :  { %875 = vmatpush1.msra.mxu0 %v2483_v16 }
 0x790   :  { %876 = vmatprep.subr.mxu0 %v2492_v18 }
 0x791   :  { %877 = vmatpush1.msra.mxu0 %v2501_v20 }
 0x792   :  { %878 = vmatprep.subr.mxu0 %v2510_v22 }
 0x793   :  { %879 = vmatpush1.msra.mxu0 %v2519_v24 }
 0x794   :  { %880 = vmatprep.subr.mxu0 %v2528_v26 }
 0x795   :  { %881 = vmatpush1.msra.mxu0 %v2537_v28 }
 0x796   :  { %882 = vmatprep.subr.mxu0 %v2546_v30 }
 0x797   :  { %883 = vmatpush1.msra.mxu0 %v2555_v32 }
 0x848   :  { %v710_v25 = vpop.f32.mrf.mxu0 }
 0x849   :  { %v715_v27 = vadd.f32 %v710_v25, %v169_v23  ;;  %v2134_v23 = vld [vmem:[%s3262_s1 + $0xa8] sm:$0xff]  ;;  %v2133_v25 = vld [vmem:[%s3262_s1 + $0xa0] sm:$0xff] }
 0x84a   :  { %v712_v31 = vpop.f32.mrf.mxu0 }
 0x84b   :  { %v2118_v29 = vmul.f32 -1.442695, %v715_v27  ;;  %v716_v34 = vadd.f32 %v712_v31, %v171_v33  ;;  %v2132_v27 = vld [vmem:[%s3262_s1 + $0x98] sm:$0xff]  ;;  %v2130_v31 = vld [vmem:[%s3262_s1 + $0x88] sm:$0xff]  ;;  %v2129_v33 = vld [vmem:[%s3262_s1 + $0x80] sm:$0xff] }
 0x84d   :  { %2243 = vpow2.f32 %v2118_v29  ;;  %v2119_v43 = vmul.f32 -1.442695, %v716_v34  ;;  %v2131_v29 = vld [vmem:[%s3262_s1 + $0x90] sm:$0xff] }
 0x84e   :  { %2245 = vtanh.f32 %v716_v34  ;;  %v1056_v34 = vld [vmem:[%s3266_s4] sm:$0xff] }
 0x85a   :  { %v2244_v37 = vpop.eup %2243 }
 0x85b   :  { %v720_v39 = vadd.f32 1.0, %v2244_v37  ;;  %v2246_v40 = vpop.eup %2245  ;;  %v1057_v37 = vld [vmem:[%s3266_s4 + $0x8] sm:$0xff] }
 0x85d   :  { %2247 = vrcp.f32 %v720_v39  ;;  %v1058_v39 = vld [vmem:[%s3266_s4 + $0x10] sm:$0xff] }
 0x85e   :  { %2249 = vpow2.f32 %v2119_v43  ;;  %v181_v43 = vadd.f32 %v2717_v62, %v2609_v38  ;;  %v2905_v62 = vld [vmem:[%s3263_s2 + $0xf8] sm:$0xff] }
 0x86a   :  { %v2248_v41 = vpop.eup %2247 }
 0x86b   :  { %v731_v42 = vmul.f32 %v2248_v41, %v2246_v40  ;;  %v2250_v58 = vpop.eup %2249  ;;  %v730_v47 = vmul.f32 %v2248_v41, %v632_v15  ;;  %v2139_v15 = vld [vmem:[%s3262_s1 + $0xd0] sm:$0xff]  ;;  %v1059_v40 = vld [vmem:[%s3266_s4 + $0x18] sm:$0xff] }
 0x86c   :  { %v727_v46 = vadd.f32 1.0, %v2250_v58 }
 0x86d   :  { %733 = vrot.lane.b32.xlu0 %v731_v42, %s2388_s5 }
 0x86e   :  { %2251 = vrcp.f32 %v727_v46 }
 0x87b   :  { %v2252_v59 = vpop.eup %2251 }
 0x8df   :  { %v734_v48 = vpop.permute.xlu0 %733 }
 0x8e0   :  { %v736_v49 = vadd.f32 %v734_v48, %v730_v47 }
 0x8e2   :  { %2253 = vtanh.f32 %v736_v49 }
 0x8ef   :  { %v2254_v50 = vpop.eup %2253 }
 0x8f0   :  { %v738_v51 = vmul.f32 %v2254_v50, %v2252_v59 }
 0x8f2   :  { %740 = vrot.lane.b32.xlu1 %v738_v51, %s2388_s5 }
 0x964   :  { %v741_v52 = vpop.permute.xlu1 %740 }
 0x965   :  { %743 = vst.msk [vmem:[%s3266_s4 + $0x20] sm:$0xff] %vm53_vm0, %v741_v52  ;;  %2120 = vmatmul.mubr.msk.f32.vlgmr.msra.gmra.mxu1 %vm53_vm0, %v741_v52 }
 0x966   :  { %973 = vmatpush1.msra.mxu1 %v2431_v4  ;;  %1020 = vmatprep.mubr.f32.mxu1 %v2387_v3  ;;  %v175_v4 = vadd.f32 %v2713_v60, %v2609_v38 }
 0x967   :  { %974 = vmatprep.subr.mxu1 %v2439_v6 }
 0x968   :  { %975 = vmatpush1.msra.mxu1 %v2448_v8 }
 0x969   :  { %976 = vmatprep.subr.mxu1 %v2457_v10 }
 0x96a   :  { %977 = vmatpush1.msra.mxu1 %v2465_v12 }
 0x96b   :  { %978 = vmatprep.subr.mxu1 %v2474_v14  ;;  %v177_v14 = vadd.f32 %v2715_v61, %v2615_v45 }
 0x96c   :  { %979 = vmatpush1.msra.mxu1 %v2483_v16  ;;  %v1060_v41 = vld [vmem:[%s3266_s4 + $0x20] sm:$0xff] }
 0x96d   :  { %980 = vmatprep.subr.mxu1 %v2492_v18 }
 0x96e   :  { %981 = vmatpush1.msra.mxu1 %v2501_v20 }
 0x96f   :  { %982 = vmatprep.subr.mxu1 %v2510_v22 }
 0x970   :  { %983 = vmatpush1.msra.mxu1 %v2519_v24 }
 0x971   :  { %984 = vmatprep.subr.mxu1 %v2528_v26 }
 0x972   :  { %985 = vmatpush1.msra.mxu1 %v2537_v28  ;;  %v2144_v28 = vld [vmem:[%s3262_s1 + $0xf8] sm:$0xff] }
 0x973   :  { %986 = vmatprep.subr.mxu1 %v2546_v30  ;;  %1134 = vmatprep.subr.mxu0 %v2144_v28  ;;  %v2945_v28 = vld [vmem:[%s3263_s2 + $0xc8] sm:$0xff] }
 0x974   :  { %987 = vmatpush1.msra.mxu1 %v2555_v32 }
 0x975   :  { %1282 = vmatprep.subr.mxu1 %v2905_v62 }
 0xa25   :  { %v814_v6 = vpop.f32.mrf.mxu1 }
 0xa26   :  { %v819_v8 = vadd.f32 %v814_v6, %v175_v4 }
 0xa27   :  { %v816_v12 = vpop.f32.mrf.mxu1 }
 0xa28   :  { %v2121_v10 = vmul.f32 -1.442695, %v819_v8  ;;  %v820_v16 = vadd.f32 %v816_v12, %v177_v14 }
 0xa2a   :  { %2255 = vpow2.f32 %v2121_v10  ;;  %v2122_v30 = vmul.f32 -1.442695, %v820_v16 }
 0xa2b   :  { %2257 = vtanh.f32 %v820_v16 }
 0xa37   :  { %v2256_v18 = vpop.eup %2255 }
 0xa38   :  { %v824_v20 = vadd.f32 1.0, %v2256_v18  ;;  %v2258_v22 = vpop.eup %2257  ;;  %v2916_v18 = vld [vmem:[%s3263_s2 + $0xf0] sm:$0xff] }
 0xa3a   :  { %2259 = vrcp.f32 %v824_v20  ;;  %v2921_v20 = vld [vmem:[%s3263_s2 + $0xe8] sm:$0xff] }
 0xa3b   :  { %2261 = vpow2.f32 %v2122_v30  ;;  %v2951_v30 = vld [vmem:[%s3263_s2 + $0xc0] sm:$0xff] }
 0xa47   :  { %v2260_v24 = vpop.eup %2259 }
 0xa48   :  { %v835_v26 = vmul.f32 %v2260_v24, %v2258_v22  ;;  %v2262_v32 = vpop.eup %2261  ;;  %v834_v61 = vmul.f32 %v2260_v24, %v736_v49  ;;  %v183_v49 = vadd.f32 %v2719_v63, %v2615_v45  ;;  %v2927_v22 = vld [vmem:[%s3263_s2 + $0xe0] sm:$0xff]  ;;  %v2933_v24 = vld [vmem:[%s3263_s2 + $0xd8] sm:$0xff] }
 0xa49   :  { %v831_v60 = vadd.f32 1.0, %v2262_v32  ;;  %v2957_v32 = vld [vmem:[%s3263_s2 + $0xb8] sm:$0xff] }
 0xa4a   :  { %837 = vrot.lane.b32.xlu0 %v835_v26, %s2388_s5  ;;  %v2939_v26 = vld [vmem:[%s3263_s2 + $0xd0] sm:$0xff] }
 0xa4b   :  { %2263 = vrcp.f32 %v831_v60  ;;  %v2963_v60 = vld [vmem:[%s3263_s2 + $0xb0] sm:$0xff] }
 0xa58   :  { %v2264_v55 = vpop.eup %2263 }
 0xabc   :  { %v838_v53 = vpop.permute.xlu0 %837 }
 0xabd   :  { %v2812_v54 = vadd.f32 %v838_v53, %v834_v61  ;;  %v2969_v53 = vld [vmem:[%s3263_s2 + $0xa8] sm:$0xff] }
 0xabf   :  { %2265 = vtanh.f32 %v2812_v54 }
 0xacc   :  { %v2266_v5 = vpop.eup %2265 }
 0xacd   :  { %v842_v7 = vmul.f32 %v2266_v5, %v2264_v55  ;;  %v2975_v55 = vld [vmem:[%s3263_s2 + $0xa0] sm:$0xff] }
 0xacf   :  { %844 = vrot.lane.b32.xlu1 %v842_v7, %s2388_s5  ;;  %v2981_v7 = vld [vmem:[%s3263_s2 + $0x98] sm:$0xff] }
 0xb41   :  { %v845_v56 = vpop.permute.xlu1 %844 }
 0xb42   :  { %847 = vst.msk [vmem:[%s3266_s4 + $0x28] sm:$0xff] %vm53_vm0, %v845_v56  ;;  %2123 = vmatmul.mubr.msk.f32.vlgmr.msra.gmra.mxu0 %vm53_vm0, %v845_v56  ;;  %v2994_v56 = vld [vmem:[%s3263_s2 + $0x88] sm:$0xff] }
 0xb43   :  { %1135 = vmatpush1.msra.mxu0 %v2143_v1  ;;  %1182 = vmatprep.mubr.f32.mxu0 %v2387_v3  ;;  %v2987_v1 = vld [vmem:[%s3263_s2 + $0x90] sm:$0xff] }
 0xb44   :  { %1136 = vmatprep.subr.mxu0 %v2142_v9  ;;  %v3000_v9 = vld [vmem:[%s3263_s2 + $0x80] sm:$0xff] }
 0xb45   :  { %1137 = vmatpush1.msra.mxu0 %v2141_v11 }
 0xb46   :  { %1138 = vmatprep.subr.mxu0 %v2140_v13 }
 0xb47   :  { %1139 = vmatpush1.msra.mxu0 %v2139_v15  ;;  %v2145_v15 = vld [vmem:[%s3265_s3 + $0x2] sm:$0x3] }
 0xb48   :  { %1140 = vmatprep.subr.mxu0 %v2138_v57 }
 0xb49   :  { %1141 = vmatpush1.msra.mxu0 %v2137_v17  ;;  %v1061_v42 = vld [vmem:[%s3266_s4 + $0x28] sm:$0xff]  ;;  %v187_v17 = vadd.f32 %v2721_v0, %v2609_v38 }
 0xb4a   :  { %1142 = vmatprep.subr.mxu0 %v2136_v19  ;;  %v3057_v19 = vrot.slane %v2145_v15, %v45_v36 }
 0xb4b   :  { %1143 = vmatpush1.msra.mxu0 %v2135_v21 }
 0xb4c   :  { %1144 = vmatprep.subr.mxu0 %v2134_v23 }
 0xb4d   :  { %1145 = vmatpush1.msra.mxu0 %v2133_v25 }
 0xb4e   :  { %1146 = vmatprep.subr.mxu0 %v2132_v27 }
 0xb4f   :  { %1147 = vmatpush1.msra.mxu0 %v2131_v29 }
 0xb50   :  { %1148 = vmatprep.subr.mxu0 %v2130_v31 }
 0xb51   :  { %1149 = vmatpush1.msra.mxu0 %v2129_v33 }
 0xb52   :  { %2146 = vmatmul.mubr.msk.f32.vlgmr.msra.gmra.mxu0 %vm53_vm0, %v1056_v34  ;;  %1490 = vmatprep.subr.mxu0 %v2905_v62 }
 0xb53   :  { %1188 = vmatprep.mubr.f32.mxu0 %v2387_v3  ;;  %1491 = vmatpush1.msra.mxu0 %v2916_v18 }
 0xb54   :  { %1492 = vmatprep.subr.mxu0 %v2921_v20 }
 0xb55   :  { %1493 = vmatpush1.msra.mxu0 %v2927_v22 }
 0xb56   :  { %2147 = vmatmul.mubr.msk.f32.gmra.mxu0 %vm53_vm0, %v1057_v37  ;;  %1494 = vmatprep.subr.mxu0 %v2933_v24  ;;  %v3062_v37 = vrot.slane %v2145_v15, %v49_v44 }
 0xb57   :  { %1194 = vmatprep.mubr.f32.mxu0 %v2387_v3  ;;  %1495 = vmatpush1.msra.mxu0 %v2939_v26 }
 0xb58   :  { %1496 = vmatprep.subr.mxu0 %v2945_v28 }
 0xb59   :  { %1497 = vmatpush1.msra.mxu0 %v2951_v30 }
 0xb5a   :  { %2148 = vmatmul.mubr.msk.f32.gmra.mxu0 %vm53_vm0, %v1058_v39  ;;  %1498 = vmatprep.subr.mxu0 %v2957_v32 }
 0xb5b   :  { %1200 = vmatprep.mubr.f32.mxu0 %v2387_v3  ;;  %1499 = vmatpush1.msra.mxu0 %v2963_v60 }
 0xb5c   :  { %1500 = vmatprep.subr.mxu0 %v2969_v53 }
 0xb5d   :  { %1501 = vmatpush1.msra.mxu0 %v2975_v55 }
 0xb5e   :  { %2149 = vmatmul.mubr.msk.f32.gmra.mxu0 %vm53_vm0, %v1059_v40  ;;  %1502 = vmatprep.subr.mxu0 %v2981_v7 }
 0xb5f   :  { %1206 = vmatprep.mubr.f32.mxu0 %v2387_v3  ;;  %1503 = vmatpush1.msra.mxu0 %v2987_v1 }
 0xb60   :  { %1504 = vmatprep.subr.mxu0 %v2994_v56 }
 0xb61   :  { %1505 = vmatpush1.msra.mxu0 %v3000_v9 }
 0xb62   :  { %2150 = vmatmul.mubr.msk.f32.gmra.mxu0 %vm53_vm0, %v1060_v41  ;;  %1698 = vmatprep.subr.mxu0 %v2905_v62 }
 0xb63   :  { %1212 = vmatprep.mubr.f32.mxu0 %v2387_v3 }
 0xb66   :  { %2151 = vmatmul.mubr.msk.f32.gmra.mxu0 %vm53_vm0, %v1061_v42  ;;  %v189_v42 = vadd.f32 %v2723_v2, %v2615_v45 }
 0xb67   :  { %1218 = vmatprep.mubr.f32.mxu0 %v2387_v3 }
 0xc02   :  { %v918_v58 = vpop.f32.mrf.mxu0 }
 0xc03   :  { %v923_v46 = vadd.f32 %v918_v58, %v181_v43 }
 0xc04   :  { %v920_v48 = vpop.f32.mrf.mxu0 }
 0xc05   :  { %v2124_v47 = vmul.f32 -1.442695, %v923_v46  ;;  %v924_v59 = vadd.f32 %v920_v48, %v183_v49 }
 0xc07   :  { %2267 = vpow2.f32 %v2124_v47  ;;  %v2125_v63 = vmul.f32 -1.442695, %v924_v59 }
 0xc08   :  { %2269 = vtanh.f32 %v924_v59 }
 0xc12   :  { %v1184_v21 = vpop.f32.mrf.mxu0 }
 0xc13   :  { %v1185_v27 = vadd.f32 %v1184_v21, %v3057_v19 }
 0xc14   :  { %v2268_v50 = vpop.eup %2267  ;;  %v1186_v38 = vpop.f32.mrf.mxu0 }
 0xc15   :  { %v928_v51 = vadd.f32 1.0, %v2268_v50  ;;  %v2270_v52 = vpop.eup %2269  ;;  %v1187_v36 = vadd.f32 %v1186_v38, %v3062_v37 }
 0xc16   :  { %v1190_v21 = vpop.f32.mrf.mxu0 }
 0xc17   :  { %2271 = vrcp.f32 %v928_v51 }
 0xc18   :  { %2273 = vpow2.f32 %v2125_v63 }
 0xc24   :  { %v2272_v4 = vpop.eup %2271 }
 0xc25   :  { %v939_v6 = vmul.f32 %v2272_v4, %v2270_v52  ;;  %v2274_v8 = vpop.eup %2273  ;;  %v938_v12 = vmul.f32 %v2272_v4, %v2812_v54 }
 0xc26   :  { %v935_v10 = vadd.f32 1.0, %v2274_v8 }
 0xc27   :  { %941 = vrot.lane.b32.xlu0 %v939_v6, %s2388_s5 }
 0xc28   :  { %2275 = vrcp.f32 %v935_v10 }
 0xc35   :  { %v2276_v61 = vpop.eup %2275 }
 0xc99   :  { %v942_v14 = vpop.permute.xlu0 %941 }
 0xc9a   :  { %v2910_v16 = vadd.f32 %v942_v14, %v938_v12 }
 0xc9c   :  { %2277 = vtanh.f32 %v2910_v16 }
 0xca9   :  { %v2278_v54 = vpop.eup %2277 }
 0xcaa   :  { %v946_v5 = vmul.f32 %v2278_v54, %v2276_v61 }
 0xcac   :  { %948 = vrot.lane.b32.xlu1 %v946_v5, %s2388_s5 }
 0xd1e   :  { %v949_v11 = vpop.permute.xlu1 %948 }
 0xd1f   :  { %951 = vst.msk [vmem:[%s3266_s4 + $0x30] sm:$0xff] %vm53_vm0, %v949_v11  ;;  %2126 = vmatmul.mubr.msk.f32.vlgmr.msra.gmra.mxu1 %vm53_vm0, %v949_v11 }
 0xd20   :  { %1283 = vmatpush1.msra.mxu1 %v2916_v18  ;;  %1330 = vmatprep.mubr.f32.mxu1 %v2387_v3 }
 0xd21   :  { %1284 = vmatprep.subr.mxu1 %v2921_v20 }
 0xd22   :  { %1285 = vmatpush1.msra.mxu1 %v2927_v22 }
 0xd23   :  { %1286 = vmatprep.subr.mxu1 %v2933_v24 }
 0xd24   :  { %1287 = vmatpush1.msra.mxu1 %v2939_v26 }
 0xd25   :  { %1288 = vmatprep.subr.mxu1 %v2945_v28 }
 0xd26   :  { %1289 = vmatpush1.msra.mxu1 %v2951_v30  ;;  %v1062_v13 = vld [vmem:[%s3266_s4 + $0x30] sm:$0xff] }
 0xd27   :  { %1290 = vmatprep.subr.mxu1 %v2957_v32  ;;  %2152 = vmatmul.mubr.msk.f32.gmra.mxu0 %vm53_vm0, %v1062_v13 }
 0xd28   :  { %1291 = vmatpush1.msra.mxu1 %v2963_v60  ;;  %1224 = vmatprep.mubr.f32.mxu0 %v2387_v3 }
 0xd29   :  { %1292 = vmatprep.subr.mxu1 %v2969_v53 }
 0xd2a   :  { %1293 = vmatpush1.msra.mxu1 %v2975_v55 }
 0xd2b   :  { %1294 = vmatprep.subr.mxu1 %v2981_v7 }
 0xd2c   :  { %1295 = vmatpush1.msra.mxu1 %v2987_v1 }
 0xd2d   :  { %1296 = vmatprep.subr.mxu1 %v2994_v56 }
 0xd2e   :  { %1297 = vmatpush1.msra.mxu1 %v3000_v9 }
 0xd2f   :  { %1331 = vmatmul.mubr.f32.vlgmr.msra.gmra.mxu1 %v2387_v3  ;;  %1386 = vmatprep.subr.mxu1 %v2905_v62 }
 0xd30   :  { %1387 = vmatpush1.msra.mxu1 %v2916_v18  ;;  %1434 = vmatprep.mubr.f32.mxu1 %v2387_v3 }
 0xd31   :  { %1388 = vmatprep.subr.mxu1 %v2921_v20 }
 0xd32   :  { %1389 = vmatpush1.msra.mxu1 %v2927_v22 }
 0xd33   :  { %1390 = vmatprep.subr.mxu1 %v2933_v24 }
 0xd34   :  { %1391 = vmatpush1.msra.mxu1 %v2939_v26 }
 0xd35   :  { %1392 = vmatprep.subr.mxu1 %v2945_v28 }
 0xd36   :  { %1393 = vmatpush1.msra.mxu1 %v2951_v30 }
 0xd37   :  { %1394 = vmatprep.subr.mxu1 %v2957_v32 }
 0xd38   :  { %1395 = vmatpush1.msra.mxu1 %v2963_v60 }
 0xd39   :  { %1396 = vmatprep.subr.mxu1 %v2969_v53 }
 0xd3a   :  { %1397 = vmatpush1.msra.mxu1 %v2975_v55 }
 0xd3b   :  { %1398 = vmatprep.subr.mxu1 %v2981_v7 }
 0xd3c   :  { %1399 = vmatpush1.msra.mxu1 %v2987_v1 }
 0xd3d   :  { %1400 = vmatprep.subr.mxu1 %v2994_v56 }
 0xd3e   :  { %1401 = vmatpush1.msra.mxu1 %v3000_v9 }
 0xd3f   :  { %1594 = vmatprep.subr.mxu1 %v2905_v62 }
 0xddf   :  { %v1022_v57 = vpop.f32.mrf.mxu1 }
 0xde0   :  { %v1027_v23 = vadd.f32 %v1022_v57, %v187_v17 }
 0xde1   :  { %v1024_v25 = vpop.f32.mrf.mxu1 }
 0xde2   :  { %v2127_v29 = vmul.f32 -1.442695, %v1027_v23  ;;  %v1028_v46 = vadd.f32 %v1024_v25, %v189_v42  ;;  %v1191_v23 = vadd.f32 %v1190_v21, %v3057_v19 }
 0xde4   :  { %2279 = vpow2.f32 %v2127_v29  ;;  %v2128_v51 = vmul.f32 -1.442695, %v1028_v46 }
 0xdef   :  { %v1332_v31 = vpop.f32.mrf.mxu1 }
 0xdf0   :  { %v1337_v33 = vadd.f32 %v1332_v31, %v1185_v27  ;;  %v1192_v31 = vpop.f32.mrf.mxu0 }
 0xdf1   :  { %v1334_v0 = vpop.f32.mrf.mxu1  ;;  %v2280_v39 = vpop.eup %2279 }
 0xdf2   :  { %v2170_v34 = vmul.f32 -1.442695, %v1337_v33  ;;  %v1338_v40 = vadd.f32 %v1334_v0, %v1187_v36  ;;  %v1032_v43 = vadd.f32 1.0, %v2280_v39 }
 0xdf4   :  { %2281 = vpow2.f32 %v2170_v34  ;;  %v2171_v50 = vmul.f32 -1.442695, %v1338_v40  ;;  %v1193_v34 = vadd.f32 %v1192_v31, %v3062_v37 }
 0xdf5   :  { %2283 = vtanh.f32 %v1338_v40 }
 0xe01   :  { %v2282_v41 = vpop.eup %2281 }
 0xe02   :  { %v1342_v58 = vadd.f32 1.0, %v2282_v41  ;;  %v2284_v35 = vpop.eup %2283 }
 0xe04   :  { %2285 = vrcp.f32 %v1342_v58 }
 0xe05   :  { %2287 = vrcp.f32 %v1032_v43 }
 0xe06   :  { %2289 = vtanh.f32 %v1028_v46 }
 0xe07   :  { %2291 = vpow2.f32 %v2171_v50  ;;  %v1196_v50 = vpop.f32.mrf.mxu0 }
 0xe08   :  { %2293 = vpow2.f32 %v2128_v51 }
 0xe09   :  { %v1198_v51 = vpop.f32.mrf.mxu0 }
 0xe11   :  { %v2286_v44 = vpop.eup %2285 }
 0xe12   :  { %v1353_v47 = vmul.f32 %v2286_v44, %v2284_v35  ;;  %v2288_v48 = vpop.eup %2287  ;;  %v1352_v4 = vmul.f32 0.0, %v2286_v44 }
 0xe13   :  { %v2290_v49 = vpop.eup %2289  ;;  %v1042_v10 = vmul.f32 %v2288_v48, %v2910_v16 }
 0xe14   :  { %1355 = vrot.lane.b32.xlu0 %v1353_v47, %s2388_s5  ;;  %v1043_v59 = vmul.f32 %v2290_v49, %v2288_v48  ;;  %v2292_v45 = vpop.eup %2291 }
 0xe15   :  { %v1349_v2 = vadd.f32 1.0, %v2292_v45  ;;  %v2294_v52 = vpop.eup %2293  ;;  %v1202_v45 = vpop.f32.mrf.mxu0 }
 0xe16   :  { %v1039_v8 = vadd.f32 1.0, %v2294_v52 }
 0xe17   :  { %2295 = vrcp.f32 %v1349_v2  ;;  %v3133_v2 = vpop.f32.mrf.mxu0 }
 0xe18   :  { %1045 = vrot.lane.b32.xlu0 %v1043_v59, %s2388_s5 }
 0xe19   :  { %v3135_v52 = vpop.f32.mrf.mxu0 }
 0xe24   :  { %v2296_v61 = vpop.eup %2295 }
 0xe86   :  { %v1356_v6 = vpop.permute.xlu0 %1355 }
 0xe87   :  { %v3069_v63 = vadd.f32 %v1356_v6, %v1352_v4  ;;  %v3137_v4 = vpop.f32.mrf.mxu0 }
 0xe89   :  { %2297 = vtanh.f32 %v3069_v63  ;;  %v3139_v6 = vpop.f32.mrf.mxu0 }
 0xe8a   :  { %v1046_v12 = vpop.permute.xlu0 %1045  ;;  %2299 = vrcp.f32 %v1039_v8 }
 0xe8b   :  { %v1048_v14 = vadd.f32 %v1046_v12, %v1042_v10 }
 0xe8d   :  { %2301 = vtanh.f32 %v1048_v14 }
 0xe96   :  { %v2298_v54 = vpop.eup %2297 }
 0xe97   :  { %v1360_v5 = vmul.f32 %v2298_v54, %v2296_v61  ;;  %v2300_v11 = vpop.eup %2299  ;;  %v1197_v61 = vadd.f32 %v1196_v50, %v3057_v19 }
 0xe99   :  { %1362 = vrot.lane.b32.xlu1 %v1360_v5, %s2388_s5 }
 0xe9a   :  { %v2302_v13 = vpop.eup %2301 }
 0xe9b   :  { %v1050_v15 = vmul.f32 %v2302_v13, %v2300_v11 }
 0xe9d   :  { %1052 = vrot.lane.b32.xlu0 %v1050_v15, %s2388_s5  ;;  %v1199_v15 = vadd.f32 %v1198_v51, %v3062_v37 }
 0xf0b   :  { %v1363_v57 = vpop.permute.xlu1 %1362 }
 0xf0c   :  { %1365 = vst.msk [vmem:[%s3266_s4] sm:$0xff] %vm53_vm0, %v1363_v57  ;;  %2172 = vmatmul.mubr.msk.f32.vlgmr.msra.gmra.mxu1 %vm53_vm0, %v1363_v57 }
 0xf0d   :  { %1595 = vmatpush1.msra.mxu1 %v2916_v18  ;;  %1642 = vmatprep.mubr.f32.mxu1 %v2387_v3 }
 0xf0e   :  { %1596 = vmatprep.subr.mxu1 %v2921_v20 }
 0xf0f   :  { %v1053_v16 = vpop.permute.xlu0 %1052  ;;  %1597 = vmatpush1.msra.mxu1 %v2927_v22 }
 0xf10   :  { %1055 = vst.msk [vmem:[%s3266_s4 + $0x38] sm:$0xff] %vm53_vm0, %v1053_v16  ;;  %1598 = vmatprep.subr.mxu1 %v2933_v24 }
 0xf11   :  { %1599 = vmatpush1.msra.mxu1 %v2939_v26 }
 0xf12   :  { %1600 = vmatprep.subr.mxu1 %v2945_v28 }
 0xf13   :  { %1601 = vmatpush1.msra.mxu1 %v2951_v30 }
 0xf14   :  { %1602 = vmatprep.subr.mxu1 %v2957_v32 }
 0xf15   :  { %1603 = vmatpush1.msra.mxu1 %v2963_v60 }
 0xf16   :  { %1604 = vmatprep.subr.mxu1 %v2969_v53 }
 0xf17   :  { %v1063_v17 = vld [vmem:[%s3266_s4 + $0x38] sm:$0xff]  ;;  %1605 = vmatpush1.msra.mxu1 %v2975_v55 }
 0xf18   :  { %2153 = vmatmul.mubr.msk.f32.gmra.mxu0 %vm53_vm0, %v1063_v17  ;;  %1606 = vmatprep.subr.mxu1 %v2981_v7 }
 0xf19   :  { %1538 = vmatprep.mubr.f32.mxu0 %v2387_v3  ;;  %1607 = vmatpush1.msra.mxu1 %v2987_v1 }
 0xf1a   :  { %1608 = vmatprep.subr.mxu1 %v2994_v56 }
 0xf1b   :  { %1609 = vmatpush1.msra.mxu1 %v3000_v9 }
 0xf1c   :  { %1802 = vmatprep.subr.mxu1 %v2905_v62 }
 0xfcc   :  { %v1436_v25 = vpop.f32.mrf.mxu1 }
 0xfcd   :  { %v1441_v27 = vadd.f32 %v1436_v25, %v1191_v23 }
 0xfce   :  { %v1438_v33 = vpop.f32.mrf.mxu1 }
 0xfcf   :  { %v2173_v29 = vmul.f32 -1.442695, %v1441_v27  ;;  %v1442_v38 = vadd.f32 %v1438_v33, %v1193_v34 }
 0xfd1   :  { %2303 = vpow2.f32 %v2173_v29  ;;  %v2174_v42 = vmul.f32 -1.442695, %v1442_v38 }
 0xfd2   :  { %2305 = vtanh.f32 %v1442_v38 }
 0xfde   :  { %v2304_v0 = vpop.eup %2303 }
 0xfdf   :  { %v1446_v36 = vadd.f32 1.0, %v2304_v0  ;;  %v2306_v39 = vpop.eup %2305 }
 0xfe1   :  { %2307 = vrcp.f32 %v1446_v36 }
 0xfe2   :  { %2309 = vpow2.f32 %v2174_v42 }
 0xfee   :  { %v2308_v40 = vpop.eup %2307 }
 0xfef   :  { %v1457_v41 = vmul.f32 %v2308_v40, %v2306_v39  ;;  %v2310_v43 = vpop.eup %2309  ;;  %v1456_v46 = vmul.f32 %v2308_v40, %v3069_v63  ;;  %v3141_v63 = vpop.f32.mrf.mxu0 }
 0xff0   :  { %v1453_v58 = vadd.f32 1.0, %v2310_v43 }
 0xff1   :  { %1459 = vrot.lane.b32.xlu1 %v1457_v41, %s2388_s5  ;;  %v3143_v8 = vpop.f32.mrf.mxu0  ;;  %v1203_v41 = vadd.f32 %v1202_v45, %v3057_v19 }
 0xff2   :  { %2311 = vrcp.f32 %v1453_v58 }
 0xff3   :  { %v3145_v10 = vpop.f32.mrf.mxu0 }
 0xff5   :  { %v3147_v12 = vpop.f32.mrf.mxu0 }
 0xff7   :  { %v3149_v14 = vpop.f32.mrf.mxu0 }
 0xfff   :  { %v2312_v47 = vpop.eup %2311 }
0x1063   :  { %v1460_v35 = vpop.permute.xlu1 %1459 }
0x1064   :  { %v1462_v44 = vadd.f32 %v1460_v35, %v1456_v46  ;;  %v1205_v35 = vadd.f32 %v3133_v2, %v3062_v37 }
0x1066   :  { %2313 = vtanh.f32 %v1462_v44 }
0x1073   :  { %v2314_v48 = vpop.eup %2313 }
0x1074   :  { %v1464_v49 = vmul.f32 %v2314_v48, %v2312_v47 }
0x1076   :  { %1466 = vrot.lane.b32.xlu1 %v1464_v49, %s2388_s5 }
0x10e8   :  { %v1467_v59 = vpop.permute.xlu1 %1466 }
0x10e9   :  { %1469 = vst.msk [vmem:[%s3266_s4 + $0x8] sm:$0xff] %vm53_vm0, %v1467_v59  ;;  %2175 = vmatmul.mubr.msk.f32.vlgmr.msra.gmra.mxu0 %vm53_vm0, %v1467_v59 }
0x10ea   :  { %1699 = vmatpush1.msra.mxu0 %v2916_v18  ;;  %1746 = vmatprep.mubr.f32.mxu0 %v2387_v3 }
0x10eb   :  { %1700 = vmatprep.subr.mxu0 %v2921_v20 }
0x10ec   :  { %1701 = vmatpush1.msra.mxu0 %v2927_v22 }
0x10ed   :  { %1702 = vmatprep.subr.mxu0 %v2933_v24 }
0x10ee   :  { %1703 = vmatpush1.msra.mxu0 %v2939_v26 }
0x10ef   :  { %1704 = vmatprep.subr.mxu0 %v2945_v28 }
0x10f0   :  { %1705 = vmatpush1.msra.mxu0 %v2951_v30 }
0x10f1   :  { %1706 = vmatprep.subr.mxu0 %v2957_v32 }
0x10f2   :  { %1707 = vmatpush1.msra.mxu0 %v2963_v60 }
0x10f3   :  { %1708 = vmatprep.subr.mxu0 %v2969_v53 }
0x10f4   :  { %1709 = vmatpush1.msra.mxu0 %v2975_v55 }
0x10f5   :  { %1710 = vmatprep.subr.mxu0 %v2981_v7 }
0x10f6   :  { %1711 = vmatpush1.msra.mxu0 %v2987_v1 }
0x10f7   :  { %1712 = vmatprep.subr.mxu0 %v2994_v56 }
0x10f8   :  { %1713 = vmatpush1.msra.mxu0 %v3000_v9 }
0x10f9   :  { %1906 = vmatprep.subr.mxu0 %v2905_v62 }
0x11a9   :  { %v1540_v54 = vpop.f32.mrf.mxu0 }
0x11aa   :  { %v1545_v5 = vadd.f32 %v1540_v54, %v1197_v61 }
0x11ab   :  { %v1542_v13 = vpop.f32.mrf.mxu0 }
0x11ac   :  { %v2176_v11 = vmul.f32 -1.442695, %v1545_v5  ;;  %v1546_v57 = vadd.f32 %v1542_v13, %v1199_v15 }
0x11ae   :  { %2315 = vpow2.f32 %v2176_v11  ;;  %v2177_v27 = vmul.f32 -1.442695, %v1546_v57 }
0x11af   :  { %2317 = vtanh.f32 %v1546_v57  ;;  %v1209_v57 = vadd.f32 %v3135_v52, %v3057_v19 }
0x11bb   :  { %v2316_v16 = vpop.eup %2315 }
0x11bc   :  { %v1550_v17 = vadd.f32 1.0, %v2316_v16  ;;  %v2318_v21 = vpop.eup %2317 }
0x11be   :  { %2319 = vrcp.f32 %v1550_v17 }
0x11bf   :  { %2321 = vpow2.f32 %v2177_v27 }
0x11cb   :  { %v2320_v23 = vpop.eup %2319 }
0x11cc   :  { %v1561_v25 = vmul.f32 %v2320_v23, %v2318_v21  ;;  %v2322_v29 = vpop.eup %2321  ;;  %v1560_v33 = vmul.f32 %v2320_v23, %v1462_v44 }
0x11cd   :  { %v1557_v31 = vadd.f32 1.0, %v2322_v29 }
0x11ce   :  { %1563 = vrot.lane.b32.xlu0 %v1561_v25, %s2388_s5  ;;  %v1211_v25 = vadd.f32 %v3137_v4, %v3062_v37 }
0x11cf   :  { %2323 = vrcp.f32 %v1557_v31 }
0x11dc   :  { %v2324_v0 = vpop.eup %2323 }
0x1240   :  { %v1564_v34 = vpop.permute.xlu0 %1563 }
0x1241   :  { %v1566_v38 = vadd.f32 %v1564_v34, %v1560_v33 }
0x1243   :  { %2325 = vtanh.f32 %v1566_v38 }
0x1250   :  { %v2326_v36 = vpop.eup %2325 }
0x1251   :  { %v1568_v39 = vmul.f32 %v2326_v36, %v2324_v0 }
0x1253   :  { %1570 = vrot.lane.b32.xlu1 %v1568_v39, %s2388_s5 }
0x12c5   :  { %v1571_v40 = vpop.permute.xlu1 %1570 }
0x12c6   :  { %1573 = vst.msk [vmem:[%s3266_s4 + $0x10] sm:$0xff] %vm53_vm0, %v1571_v40  ;;  %2178 = vmatmul.mubr.msk.f32.vlgmr.msra.gmra.mxu1 %vm53_vm0, %v1571_v40 }
0x12c7   :  { %1803 = vmatpush1.msra.mxu1 %v2916_v18  ;;  %1850 = vmatprep.mubr.f32.mxu1 %v2387_v3 }
0x12c8   :  { %1804 = vmatprep.subr.mxu1 %v2921_v20 }
0x12c9   :  { %1805 = vmatpush1.msra.mxu1 %v2927_v22 }
0x12ca   :  { %1806 = vmatprep.subr.mxu1 %v2933_v24 }
0x12cb   :  { %1807 = vmatpush1.msra.mxu1 %v2939_v26 }
0x12cc   :  { %1808 = vmatprep.subr.mxu1 %v2945_v28 }
0x12cd   :  { %1809 = vmatpush1.msra.mxu1 %v2951_v30 }
0x12ce   :  { %1810 = vmatprep.subr.mxu1 %v2957_v32 }
0x12cf   :  { %1811 = vmatpush1.msra.mxu1 %v2963_v60 }
0x12d0   :  { %1812 = vmatprep.subr.mxu1 %v2969_v53 }
0x12d1   :  { %1813 = vmatpush1.msra.mxu1 %v2975_v55 }
0x12d2   :  { %1814 = vmatprep.subr.mxu1 %v2981_v7 }
0x12d3   :  { %1815 = vmatpush1.msra.mxu1 %v2987_v1 }
0x12d4   :  { %1816 = vmatprep.subr.mxu1 %v2994_v56 }
0x12d5   :  { %1817 = vmatpush1.msra.mxu1 %v3000_v9 }
0x12d6   :  { %2010 = vmatprep.subr.mxu1 %v2905_v62 }
0x1386   :  { %v1644_v42 = vpop.f32.mrf.mxu1 }
0x1387   :  { %v1649_v43 = vadd.f32 %v1644_v42, %v1203_v41 }
0x1388   :  { %v1646_v46 = vpop.f32.mrf.mxu1 }
0x1389   :  { %v2179_v58 = vmul.f32 -1.442695, %v1649_v43  ;;  %v1650_v44 = vadd.f32 %v1646_v46, %v1205_v35 }
0x138b   :  { %2327 = vpow2.f32 %v2179_v58  ;;  %v2180_v62 = vmul.f32 -1.442695, %v1650_v44 }
0x138c   :  { %2329 = vtanh.f32 %v1650_v44 }
0x1398   :  { %v2328_v47 = vpop.eup %2327 }
0x1399   :  { %v1654_v48 = vadd.f32 1.0, %v2328_v47  ;;  %v2330_v49 = vpop.eup %2329 }
0x139b   :  { %2331 = vrcp.f32 %v1654_v48  ;;  %v1221_v48 = vadd.f32 %v3143_v8, %v3057_v19 }
0x139c   :  { %2333 = vpow2.f32 %v2180_v62 }
0x13a8   :  { %v2332_v59 = vpop.eup %2331 }
0x13a9   :  { %v1665_v50 = vmul.f32 %v2332_v59, %v2330_v49  ;;  %v2334_v51 = vpop.eup %2333  ;;  %v1664_v61 = vmul.f32 %v2332_v59, %v1566_v38 }
0x13aa   :  { %v1661_v45 = vadd.f32 1.0, %v2334_v51  ;;  %v1223_v51 = vadd.f32 %v3145_v10, %v3062_v37 }
0x13ab   :  { %1667 = vrot.lane.b32.xlu0 %v1665_v50, %s2388_s5 }
0x13ac   :  { %2335 = vrcp.f32 %v1661_v45 }
0x13b9   :  { %v2336_v2 = vpop.eup %2335 }
0x141d   :  { %v1668_v54 = vpop.permute.xlu0 %1667 }
0x141e   :  { %v1670_v5 = vadd.f32 %v1668_v54, %v1664_v61 }
0x1420   :  { %2337 = vtanh.f32 %v1670_v5 }
0x142d   :  { %v2338_v11 = vpop.eup %2337 }
0x142e   :  { %v1672_v13 = vmul.f32 %v2338_v11, %v2336_v2 }
0x1430   :  { %1674 = vrot.lane.b32.xlu1 %v1672_v13, %s2388_s5 }
0x14a2   :  { %v1675_v15 = vpop.permute.xlu1 %1674 }
0x14a3   :  { %1677 = vst.msk [vmem:[%s3266_s4 + $0x18] sm:$0xff] %vm53_vm0, %v1675_v15  ;;  %2181 = vmatmul.mubr.msk.f32.vlgmr.msra.gmra.mxu0 %vm53_vm0, %v1675_v15 }
0x14a4   :  { %1907 = vmatpush1.msra.mxu0 %v2916_v18  ;;  %1954 = vmatprep.mubr.f32.mxu0 %v2387_v3 }
0x14a5   :  { %1908 = vmatprep.subr.mxu0 %v2921_v20 }
0x14a6   :  { %1909 = vmatpush1.msra.mxu0 %v2927_v22 }
0x14a7   :  { %1910 = vmatprep.subr.mxu0 %v2933_v24 }
0x14a8   :  { %1911 = vmatpush1.msra.mxu0 %v2939_v26 }
0x14a9   :  { %1912 = vmatprep.subr.mxu0 %v2945_v28 }
0x14aa   :  { %1913 = vmatpush1.msra.mxu0 %v2951_v30 }
0x14ab   :  { %1914 = vmatprep.subr.mxu0 %v2957_v32 }
0x14ac   :  { %1915 = vmatpush1.msra.mxu0 %v2963_v60 }
0x14ad   :  { %1916 = vmatprep.subr.mxu0 %v2969_v53 }
0x14ae   :  { %1917 = vmatpush1.msra.mxu0 %v2975_v55 }
0x14af   :  { %1918 = vmatprep.subr.mxu0 %v2981_v7 }
0x14b0   :  { %1919 = vmatpush1.msra.mxu0 %v2987_v1 }
0x14b1   :  { %1920 = vmatprep.subr.mxu0 %v2994_v56 }
0x14b2   :  { %1921 = vmatpush1.msra.mxu0 %v3000_v9 }
0x1563   :  { %v1748_v16 = vpop.f32.mrf.mxu0 }
0x1564   :  { %v1753_v17 = vadd.f32 %v1748_v16, %v1209_v57 }
0x1565   :  { %v1750_v23 = vpop.f32.mrf.mxu0 }
0x1566   :  { %v2182_v21 = vmul.f32 -1.442695, %v1753_v17  ;;  %v1754_v27 = vadd.f32 %v1750_v23, %v1211_v25 }
0x1568   :  { %2339 = vpow2.f32 %v2182_v21  ;;  %v2183_v0 = vmul.f32 -1.442695, %v1754_v27 }
0x1569   :  { %2341 = vtanh.f32 %v1754_v27  ;;  %v1227_v27 = vadd.f32 %v3147_v12, %v3057_v19 }
0x1575   :  { %v2340_v29 = vpop.eup %2339 }
0x1576   :  { %v1758_v31 = vadd.f32 1.0, %v2340_v29  ;;  %v2342_v33 = vpop.eup %2341 }
0x1578   :  { %2343 = vrcp.f32 %v1758_v31 }
0x1579   :  { %2345 = vpow2.f32 %v2183_v0 }
0x1585   :  { %v2344_v34 = vpop.eup %2343 }
0x1586   :  { %v1769_v38 = vmul.f32 %v2344_v34, %v2342_v33  ;;  %v2346_v52 = vpop.eup %2345  ;;  %v1768_v39 = vmul.f32 %v2344_v34, %v1670_v5 }
0x1587   :  { %v1765_v36 = vadd.f32 1.0, %v2346_v52 }
0x1588   :  { %1771 = vrot.lane.b32.xlu0 %v1769_v38, %s2388_s5  ;;  %v1229_v38 = vadd.f32 %v3149_v14, %v3062_v37 }
0x1589   :  { %2347 = vrcp.f32 %v1765_v36 }
0x1596   :  { %v2348_v4 = vpop.eup %2347 }
0x15fa   :  { %v1772_v40 = vpop.permute.xlu0 %1771 }
0x15fb   :  { %v1774_v41 = vadd.f32 %v1772_v40, %v1768_v39 }
0x15fd   :  { %2349 = vtanh.f32 %v1774_v41 }
0x160a   :  { %v2350_v42 = vpop.eup %2349 }
0x160b   :  { %v1776_v43 = vmul.f32 %v2350_v42, %v2348_v4 }
0x160d   :  { %1778 = vrot.lane.b32.xlu1 %v1776_v43, %s2388_s5 }
0x167f   :  { %v1779_v58 = vpop.permute.xlu1 %1778 }
0x1680   :  { %1781 = vst.msk [vmem:[%s3266_s4 + $0x20] sm:$0xff] %vm53_vm0, %v1779_v58  ;;  %2184 = vmatmul.mubr.msk.f32.vlgmr.msra.gmra.mxu1 %vm53_vm0, %v1779_v58 }
0x1681   :  { %2011 = vmatpush1.msra.mxu1 %v2916_v18  ;;  %2058 = vmatprep.mubr.f32.mxu1 %v2387_v3  ;;  %v1215_v3 = vadd.f32 %v3139_v6, %v3057_v19 }
0x1682   :  { %2012 = vmatprep.subr.mxu1 %v2921_v20 }
0x1683   :  { %2013 = vmatpush1.msra.mxu1 %v2927_v22 }
0x1684   :  { %2014 = vmatprep.subr.mxu1 %v2933_v24 }
0x1685   :  { %2015 = vmatpush1.msra.mxu1 %v2939_v26  ;;  %v1217_v26 = vadd.f32 %v3141_v63, %v3062_v37 }
0x1686   :  { %2016 = vmatprep.subr.mxu1 %v2945_v28 }
0x1687   :  { %2017 = vmatpush1.msra.mxu1 %v2951_v30 }
0x1688   :  { %2018 = vmatprep.subr.mxu1 %v2957_v32 }
0x1689   :  { %2019 = vmatpush1.msra.mxu1 %v2963_v60 }
0x168a   :  { %2020 = vmatprep.subr.mxu1 %v2969_v53 }
0x168b   :  { %2021 = vmatpush1.msra.mxu1 %v2975_v55 }
0x168c   :  { %2022 = vmatprep.subr.mxu1 %v2981_v7 }
0x168d   :  { %2023 = vmatpush1.msra.mxu1 %v2987_v1 }
0x168e   :  { %2024 = vmatprep.subr.mxu1 %v2994_v56 }
0x168f   :  { %2025 = vmatpush1.msra.mxu1 %v3000_v9 }
0x1740   :  { %v1852_v18 = vpop.f32.mrf.mxu1 }
0x1741   :  { %v1857_v20 = vadd.f32 %v1852_v18, %v1215_v3 }
0x1742   :  { %v1854_v24 = vpop.f32.mrf.mxu1 }
0x1743   :  { %v2185_v22 = vmul.f32 -1.442695, %v1857_v20  ;;  %v1858_v28 = vadd.f32 %v1854_v24, %v1217_v26 }
0x1745   :  { %2351 = vpow2.f32 %v2185_v22  ;;  %v2186_v7 = vmul.f32 -1.442695, %v1858_v28 }
0x1746   :  { %2353 = vtanh.f32 %v1858_v28 }
0x1752   :  { %v2352_v30 = vpop.eup %2351 }
0x1753   :  { %v1862_v32 = vadd.f32 1.0, %v2352_v30  ;;  %v2354_v60 = vpop.eup %2353 }
0x1755   :  { %2355 = vrcp.f32 %v1862_v32 }
0x1756   :  { %2357 = vpow2.f32 %v2186_v7 }
0x1762   :  { %v2356_v53 = vpop.eup %2355 }
0x1763   :  { %v1873_v55 = vmul.f32 %v2356_v53, %v2354_v60  ;;  %v2358_v1 = vpop.eup %2357  ;;  %v1872_v9 = vmul.f32 %v2356_v53, %v1774_v41 }
0x1764   :  { %v1869_v56 = vadd.f32 1.0, %v2358_v1 }
0x1765   :  { %1875 = vrot.lane.b32.xlu0 %v1873_v55, %s2388_s5 }
0x1766   :  { %2359 = vrcp.f32 %v1869_v56 }
0x1773   :  { %v2360_v63 = vpop.eup %2359 }
0x17d7   :  { %v1876_v6 = vpop.permute.xlu0 %1875 }
0x17d8   :  { %v1878_v46 = vadd.f32 %v1876_v6, %v1872_v9 }
0x17da   :  { %2361 = vtanh.f32 %v1878_v46 }
0x17e7   :  { %v2362_v35 = vpop.eup %2361 }
0x17e8   :  { %v1880_v44 = vmul.f32 %v2362_v35, %v2360_v63 }
0x17ea   :  { %1882 = vrot.lane.b32.xlu1 %v1880_v44, %s2388_s5 }
0x185c   :  { %v1883_v47 = vpop.permute.xlu1 %1882 }
0x185d   :  { %1885 = vst.msk [vmem:[%s3266_s4 + $0x28] sm:$0xff] %vm53_vm0, %v1883_v47  ;;  %2187 = vmatmul.mubr.msk.f32.vlgmr.msra.gmra.mxu0 %vm53_vm0, %v1883_v47 }
0x191d   :  { %v1956_v49 = vpop.f32.mrf.mxu0 }
0x191e   :  { %v1961_v59 = vadd.f32 %v1956_v49, %v1221_v48 }
0x191f   :  { %v1958_v62 = vpop.f32.mrf.mxu0 }
0x1920   :  { %v2188_v50 = vmul.f32 -1.442695, %v1961_v59  ;;  %v1962_v45 = vadd.f32 %v1958_v62, %v1223_v51 }
0x1922   :  { %2363 = vpow2.f32 %v2188_v50  ;;  %v2189_v13 = vmul.f32 -1.442695, %v1962_v45 }
0x1923   :  { %2365 = vtanh.f32 %v1962_v45 }
0x192f   :  { %v2364_v61 = vpop.eup %2363 }
0x1930   :  { %v1966_v54 = vadd.f32 1.0, %v2364_v61  ;;  %v2366_v5 = vpop.eup %2365 }
0x1932   :  { %2367 = vrcp.f32 %v1966_v54 }
0x1933   :  { %2369 = vpow2.f32 %v2189_v13 }
0x193f   :  { %v2368_v2 = vpop.eup %2367 }
0x1940   :  { %v1977_v11 = vmul.f32 %v2368_v2, %v2366_v5  ;;  %v2370_v8 = vpop.eup %2369  ;;  %v1976_v57 = vmul.f32 %v2368_v2, %v1878_v46 }
0x1941   :  { %v1973_v15 = vadd.f32 1.0, %v2370_v8 }
0x1942   :  { %1979 = vrot.lane.b32.xlu0 %v1977_v11, %s2388_s5 }
0x1943   :  { %2371 = vrcp.f32 %v1973_v15 }
0x1950   :  { %v2372_v10 = vpop.eup %2371 }
0x19b4   :  { %v1980_v16 = vpop.permute.xlu0 %1979 }
0x19b5   :  { %v1982_v17 = vadd.f32 %v1980_v16, %v1976_v57 }
0x19b7   :  { %2373 = vtanh.f32 %v1982_v17 }
0x19c4   :  { %v2374_v21 = vpop.eup %2373 }
0x19c5   :  { %v1984_v23 = vmul.f32 %v2374_v21, %v2372_v10 }
0x19c7   :  { %1986 = vrot.lane.b32.xlu1 %v1984_v23, %s2388_s5 }
0x1a39   :  { %v1987_v25 = vpop.permute.xlu1 %1986 }
0x1a3a   :  { %1989 = vst.msk [vmem:[%s3266_s4 + $0x30] sm:$0xff] %vm53_vm0, %v1987_v25  ;;  %2190 = vmatmul.mubr.msk.f32.vlgmr.msra.gmra.mxu1 %vm53_vm0, %v1987_v25 }
0x1afa   :  { %v2060_v29 = vpop.f32.mrf.mxu1 }
0x1afb   :  { %v2065_v31 = vadd.f32 %v2060_v29, %v1227_v27 }
0x1afc   :  { %v2062_v34 = vpop.f32.mrf.mxu1 }
0x1afd   :  { %v2191_v33 = vmul.f32 -1.442695, %v2065_v31  ;;  %v2066_v0 = vadd.f32 %v2062_v34, %v1229_v38 }
0x1aff   :  { %2375 = vpow2.f32 %v2191_v33  ;;  %v2192_v4 = vmul.f32 -1.442695, %v2066_v0 }
0x1b00   :  { %2377 = vtanh.f32 %v2066_v0 }
0x1b0c   :  { %v2376_v52 = vpop.eup %2375 }
0x1b0d   :  { %v2070_v36 = vadd.f32 1.0, %v2376_v52  ;;  %v2378_v39 = vpop.eup %2377 }
0x1b0f   :  { %2379 = vrcp.f32 %v2070_v36 }
0x1b10   :  { %2381 = vpow2.f32 %v2192_v4 }
0x1b1c   :  { %v2380_v40 = vpop.eup %2379 }
0x1b1d   :  { %v2081_v41 = vmul.f32 %v2380_v40, %v2378_v39  ;;  %v2382_v19 = vpop.eup %2381  ;;  %v2080_v42 = vmul.f32 %v2380_v40, %v1982_v17 }
0x1b1e   :  { %v2077_v12 = vadd.f32 1.0, %v2382_v19 }
0x1b1f   :  { %2083 = vrot.lane.b32.xlu0 %v2081_v41, %s2388_s5 }
0x1b20   :  { %2383 = vrcp.f32 %v2077_v12 }
0x1b2d   :  { %v2384_v37 = vpop.eup %2383 }
0x1b91   :  { %v2084_v43 = vpop.permute.xlu0 %2083 }
0x1b92   :  { %v2086_v58 = vadd.f32 %v2084_v43, %v2080_v42 }
0x1b94   :  { %2385 = vtanh.f32 %v2086_v58 }
0x1ba1   :  { %v2386_v14 = vpop.eup %2385 }
0x1ba2   :  { %v2088_v3 = vmul.f32 %v2386_v14, %v2384_v37 }
0x1ba4   :  { %2090 = vrot.lane.b32.xlu1 %v2088_v3, %s2388_s5 }
0x1c16   :  { %v2091_v18 = vpop.permute.xlu1 %2090 }
0x1c17   :  { %2093 = vst.msk [vmem:[%s3266_s4 + $0x38] sm:$0xff] %vm53_vm0, %v2091_v18 }

</bundles_post_ra>
